<compile_context>
chip_gen: v7x
topology: tpu7x:2x2x1
jax: 0.10.0
libtpu: 0.0.40
codegen_flags: <defaults>
</compile_context>

<pallas_src>
import functools

import jax
import jax.numpy as jnp
import numpy as np
from jax import lax
from jax.experimental import pallas as pl
from jax.experimental.pallas import tpu as pltpu

EPS = 1e-5  # nn.InstanceNorm2d default (affine=False, biased variance)


def _unet_up_kernel(x_ref, w_ref, out_ref, xpad_ref, *, N, H, W, Cin, Cout):
    # x_ref   : (N, H, W, Cin)     bf16, unpadded NHWC input (whole batch, one grid step)
    # w_ref   : (9, Cin, 4*Cout)   bf16, per-offset weights (zero where a parity skips it)
    # out_ref : (N, H*W, 4*Cout)   f32, lane = parity*Cout + c, parity = 2*ry + rx
    # xpad_ref: (H+2, W+2, Cin)    f32 scratch with a 1-pixel zero halo
    HW = H * W
    C4 = 4 * Cout
    inv_cnt = 1.0 / float(4 * HW)

    # Zero once; the interior is overwritten per sample, only the halo must stay zero.
    xpad_ref[...] = jnp.zeros_like(xpad_ref)

    for n in range(N):  # batch folded into a single grid step (static unroll)
        xpad_ref[1:H + 1, 1:W + 1, :] = x_ref[n].astype(jnp.float32)

        # 9 distinct shifted windows, each built exactly once; 9 bf16 MXU matmuls
        # accumulate the whole (HW, 4*Cout) slab in f32 (parity folded into lanes).
        y = jnp.zeros((HW, C4), jnp.float32)
        for oy in range(3):
            for ox in range(3):
                sl = xpad_ref[oy:oy + H, ox:ox + W, :].reshape(HW, Cin)
                y = y + jnp.dot(sl.astype(jnp.bfloat16), w_ref[3 * oy + ox],
                                preferred_element_type=jnp.float32)

        # InstanceNorm2d: per-channel stats over the full 2H x 2W extent (= 4*HW rows).
        # TODO(synk): E[y^2]-mean^2 can cancel for very large spatial extents; switch to a
        # two-pass / shifted variance when scaling this kernel to big feature maps.
        s = jnp.sum(y, axis=0, keepdims=True)        # (1, 4*Cout)
        sq = jnp.sum(y * y, axis=0, keepdims=True)   # (1, 4*Cout)
        s_c = (s[:, 0:Cout] + s[:, Cout:2 * Cout]
               + s[:, 2 * Cout:3 * Cout] + s[:, 3 * Cout:4 * Cout])
        sq_c = (sq[:, 0:Cout] + sq[:, Cout:2 * Cout]
                + sq[:, 2 * Cout:3 * Cout] + sq[:, 3 * Cout:4 * Cout])
        mean = s_c * inv_cnt                          # (1, Cout)
        var = sq_c * inv_cnt - mean * mean
        inv = lax.rsqrt(var + EPS)
        mean4 = jnp.concatenate([mean] * 4, axis=1)   # (1, 4*Cout)
        inv4 = jnp.concatenate([inv] * 4, axis=1)

        # Normalize + ReLU in f32, single whole-slab store (no per-parity concat).
        out_ref[n] = jnp.maximum((y - mean4) * inv4, 0.0).astype(out_ref.dtype)
    # TODO(synk): dropout layer only exists when dropout > 0; default module has none.


def _pack_weights(w, Cin, Cout):
    """Pack torch ConvTranspose2d weights (Cin, Cout, 4, 4) into (9, Cin, 4*Cout).

    Offset (oy, ox) in {0,1,2}^2 indexes the shifted window of the 1-padded input;
    for parity (ry, rx) it is used with tap (3-ry-2dy, 3-rx-2dx) iff dy=oy-ry, dx=ox-rx
    are both in {0,1}; otherwise that parity's block is zero.
    """
    zero = jnp.zeros((Cin, Cout), w.dtype)
    slabs = []
    for oy in range(3):
        for ox in range(3):
            pblocks = []
            for ry in range(2):
                for rx in range(2):
                    dy, dx = oy - ry, ox - rx
                    if dy in (0, 1) and dx in (0, 1):
                        pblocks.append(w[:, :, 3 - ry - 2 * dy, 3 - rx - 2 * dx])
                    else:
                        pblocks.append(zero)
            slabs.append(jnp.concatenate(pblocks, axis=1))   # (Cin, 4*Cout)
    return jnp.stack(slabs, axis=0)                           # (9, Cin, 4*Cout)


def unet_up_forward(x, skip, w):
    """x: (N, Cin, H, W) f32; skip: (N, Cs, 2H, 2W) f32; w: (Cin, Cout, 4, 4) torch layout."""
    N, Cin, H, W = x.shape
    Cout = w.shape[1]
    HW = H * W
    C4 = 4 * Cout

    # --- glue: NHWC + bf16 cast (halves kernel input DMA); tiny packed weights ---------
    xn = jnp.transpose(x, (0, 2, 3, 1)).astype(jnp.bfloat16)      # (N, H, W, Cin)
    w9 = _pack_weights(w, Cin, Cout).astype(jnp.bfloat16)         # (9, Cin, 4*Cout)

    kernel = functools.partial(_unet_up_kernel, N=N, H=H, W=W, Cin=Cin, Cout=Cout)

    flops = int(2 * N * HW * (9 * Cin) * C4)
    bytes_accessed = int(xn.size * 2 + w9.size * 2 + N * HW * C4 * 4)  # weights DMA'd once

    # --- Pallas hot path: pad + 9 offset matmuls + instance norm + ReLU, one grid step ---
    out = pl.pallas_call(
        kernel,
        out_shape=jax.ShapeDtypeStruct((N, HW, C4), jnp.float32),
        grid_spec=pltpu.PrefetchScalarGridSpec(
            num_scalar_prefetch=0,
            grid=(1,),
            in_specs=[
                pl.BlockSpec((N, H, W, Cin), lambda i: (0, 0, 0, 0)),
                pl.BlockSpec((9, Cin, C4), lambda i: (0, 0, 0)),
            ],
            out_specs=pl.BlockSpec((N, HW, C4), lambda i: (0, 0, 0)),
            scratch_shapes=[pltpu.VMEM((H + 2, W + 2, Cin), jnp.float32)],
        ),
        compiler_params=pltpu.CompilerParams(dimension_semantics=("arbitrary",)),
        cost_estimate=pl.CostEstimate(flops=flops,
                                      transcendentals=int(N * Cout),
                                      bytes_accessed=bytes_accessed),
    )(xn, w9)

    # --- glue: back to NCHW, then the required channel concat with the skip tensor ------
    # out[n, a*W+b, (2*ry+rx)*Cout + c] -> y[n, c, 2a+ry, 2b+rx]
    y = out.reshape(N, H, W, 2, 2, Cout)                          # (n, a, b, ry, rx, c)
    y = jnp.transpose(y, (0, 5, 1, 3, 2, 4)).reshape(N, Cout, 2 * H, 2 * W)
    return jnp.concatenate([y, skip], axis=1)


def unet_up_reference(x, skip, w):
    """Pure-JAX reference matching torch semantics (for self-check)."""
    y = lax.conv_general_dilated(
        x, jnp.flip(w, (2, 3)),
        window_strides=(1, 1), padding=((2, 2), (2, 2)),
        lhs_dilation=(2, 2),
        dimension_numbers=('NCHW', 'IOHW', 'NCHW'),
        precision=lax.Precision.HIGHEST)
    mean = jnp.mean(y, axis=(2, 3), keepdims=True)
    var = jnp.mean((y - mean) ** 2, axis=(2, 3), keepdims=True)
    y = jnp.maximum((y - mean) * lax.rsqrt(var + EPS), 0.0)
    return jnp.concatenate([y, skip], axis=1)


if __name__ == "__main__":
    N, Cin, Cout, H, W = 2, 8, 4, 8, 8
    key = jax.random.PRNGKey(0)
    kx, ks, kw = jax.random.split(key, 3)

    x = jax.random.normal(kx, (N, Cin, H, W), jnp.float32)
    skip = jax.random.normal(ks, (N, Cout, 2 * H, 2 * W), jnp.float32)
    # ConvTranspose2d weight, torch layout (in_size, out_size, 4, 4), deterministic init.
    w = jax.random.normal(kw, (Cin, Cout, 4, 4), jnp.float32) * 0.1

    out = jax.block_until_ready(unet_up_forward(x, skip, w))
    ref = jax.block_until_ready(unet_up_reference(x, skip, w))

    assert out.shape == (N, Cout + Cout, 2 * H, 2 * W), out.shape
    # Kernel uses explicit bf16 MXU operands vs HIGHEST-precision f32 in the reference;
    # post-normalization values are O(1), so a few bf16 ulps of slack is enough — any
    # decomposition bug would show as O(1) error.
    np.testing.assert_allclose(np.asarray(out), np.asarray(ref), rtol=5e-2, atol=5e-2)
    print("KERNEL_OK")
</pallas_src>

<mosaic_0001>
module attributes {stable_mosaic.version = 11 : i64} {
  func.func @_unet_up_kernel(%arg0: i32, %arg1: memref<2x8x8x8xbf16, #tpu.memory_space<vmem>>, %arg2: memref<9x8x16xbf16, #tpu.memory_space<vmem>>, %arg3: memref<2x64x16xf32, #tpu.memory_space<vmem>>, %arg4: memref<10x10x8xf32, #tpu.memory_space<vmem>>) attributes {dimension_semantics = [#tpu.dimension_semantics<arbitrary>], iteration_bounds = array<i64: 1>, scalar_prefetch = 0 : i64, scratch_operands = 1 : i64, tpu.core_type = #tpu.core_type<tc>, window_params = [{pipeline_mode = #tpu.pipeline_mode<synchronous>, transform_indices = @transform_0, window_bounds = array<i64: 2, 8, 8, 8>}, {pipeline_mode = #tpu.pipeline_mode<synchronous>, transform_indices = @transform_1, window_bounds = array<i64: 9, 8, 16>}, {pipeline_mode = #tpu.pipeline_mode<synchronous>, transform_indices = @transform_2, window_bounds = array<i64: 2, 64, 16>}]} {
    %cst = arith.constant 0.000000e+00 : f32
    %0 = vector.broadcast %cst : f32 to vector<10x10x8xf32>
    %c0 = arith.constant 0 : index
    %c0_0 = arith.constant 0 : index
    %c0_1 = arith.constant 0 : index
    %1 = vector.load %arg4[%c0, %c0_0, %c0_1] : memref<10x10x8xf32, #tpu.memory_space<vmem>>, vector<10x10x8xf32>
    tpu.vector_store %arg4[%c0, %c0_0, %c0_1], %0 {strides = array<i32>} : memref<10x10x8xf32, #tpu.memory_space<vmem>>, vector<10x10x8xf32>,
    %c0_2 = arith.constant 0 : index
    %c0_3 = arith.constant 0 : index
    %c0_4 = arith.constant 0 : index
    %c0_5 = arith.constant 0 : index
    %2 = vector.load %arg1[%c0_2, %c0_3, %c0_4, %c0_5] : memref<2x8x8x8xbf16, #tpu.memory_space<vmem>>, vector<1x8x8x8xbf16>
    %3 = vector.shape_cast %2 : vector<1x8x8x8xbf16> to vector<8x8x8xbf16>
    %4 = arith.extf %3 : vector<8x8x8xbf16> to vector<8x8x8xf32>
    %c1 = arith.constant 1 : index
    %c1_6 = arith.constant 1 : index
    %c0_7 = arith.constant 0 : index
    %5 = vector.load %arg4[%c1, %c1_6, %c0_7] : memref<10x10x8xf32, #tpu.memory_space<vmem>>, vector<8x8x8xf32>
    tpu.vector_store %arg4[%c1, %c1_6, %c0_7], %4 {strides = array<i32>} : memref<10x10x8xf32, #tpu.memory_space<vmem>>, vector<8x8x8xf32>,
    %cst_8 = arith.constant 0.000000e+00 : f32
    %6 = vector.broadcast %cst_8 : f32 to vector<64x16xf32>
    %c0_9 = arith.constant 0 : index
    %c0_10 = arith.constant 0 : index
    %c0_11 = arith.constant 0 : index
    %7 = vector.load %arg4[%c0_9, %c0_10, %c0_11] : memref<10x10x8xf32, #tpu.memory_space<vmem>>, vector<8x8x8xf32>
    %8 = vector.shape_cast %7 : vector<8x8x8xf32> to vector<64x8xf32>
    %9 = arith.truncf %8 : vector<64x8xf32> to vector<64x8xbf16>
    %c0_12 = arith.constant 0 : index
    %c0_13 = arith.constant 0 : index
    %c0_14 = arith.constant 0 : index
    %10 = vector.load %arg2[%c0_12, %c0_13, %c0_14] : memref<9x8x16xbf16, #tpu.memory_space<vmem>>, vector<1x8x16xbf16>
    %11 = vector.shape_cast %10 : vector<1x8x16xbf16> to vector<8x16xbf16>
    %cst_15 = arith.constant dense<0.000000e+00> : vector<64x16xf32>
    %12 = tpu.matmul %9, %11, %cst_15 {dimension_numbers = #tpu.dot_dimension_numbers<[1], [0], [0], [1], [0, 0, 1, 1], [], []>} : vector<64x8xbf16>, vector<8x16xbf16>, vector<64x16xf32> -> vector<64x16xf32>
    %13 = arith.addf %6, %12 : vector<64x16xf32>
    %c0_16 = arith.constant 0 : index
    %c1_17 = arith.constant 1 : index
    %c0_18 = arith.constant 0 : index
    %14 = vector.load %arg4[%c0_16, %c1_17, %c0_18] : memref<10x10x8xf32, #tpu.memory_space<vmem>>, vector<8x8x8xf32>
    %15 = vector.shape_cast %14 : vector<8x8x8xf32> to vector<64x8xf32>
    %16 = arith.truncf %15 : vector<64x8xf32> to vector<64x8xbf16>
    %c1_19 = arith.constant 1 : index
    %c0_20 = arith.constant 0 : index
    %c0_21 = arith.constant 0 : index
    %17 = vector.load %arg2[%c1_19, %c0_20, %c0_21] : memref<9x8x16xbf16, #tpu.memory_space<vmem>>, vector<1x8x16xbf16>
    %18 = vector.shape_cast %17 : vector<1x8x16xbf16> to vector<8x16xbf16>
    %cst_22 = arith.constant dense<0.000000e+00> : vector<64x16xf32>
    %19 = tpu.matmul %16, %18, %cst_22 {dimension_numbers = #tpu.dot_dimension_numbers<[1], [0], [0], [1], [0, 0, 1, 1], [], []>} : vector<64x8xbf16>, vector<8x16xbf16>, vector<64x16xf32> -> vector<64x16xf32>
    %20 = arith.addf %13, %19 : vector<64x16xf32>
    %c0_23 = arith.constant 0 : index
    %c2 = arith.constant 2 : index
    %c0_24 = arith.constant 0 : index
    %21 = vector.load %arg4[%c0_23, %c2, %c0_24] : memref<10x10x8xf32, #tpu.memory_space<vmem>>, vector<8x8x8xf32>
    %22 = vector.shape_cast %21 : vector<8x8x8xf32> to vector<64x8xf32>
    %23 = arith.truncf %22 : vector<64x8xf32> to vector<64x8xbf16>
    %c2_25 = arith.constant 2 : index
    %c0_26 = arith.constant 0 : index
    %c0_27 = arith.constant 0 : index
    %24 = vector.load %arg2[%c2_25, %c0_26, %c0_27] : memref<9x8x16xbf16, #tpu.memory_space<vmem>>, vector<1x8x16xbf16>
    %25 = vector.shape_cast %24 : vector<1x8x16xbf16> to vector<8x16xbf16>
    %cst_28 = arith.constant dense<0.000000e+00> : vector<64x16xf32>
    %26 = tpu.matmul %23, %25, %cst_28 {dimension_numbers = #tpu.dot_dimension_numbers<[1], [0], [0], [1], [0, 0, 1, 1], [], []>} : vector<64x8xbf16>, vector<8x16xbf16>, vector<64x16xf32> -> vector<64x16xf32>
    %27 = arith.addf %20, %26 : vector<64x16xf32>
    %c1_29 = arith.constant 1 : index
    %c0_30 = arith.constant 0 : index
    %c0_31 = arith.constant 0 : index
    %28 = vector.load %arg4[%c1_29, %c0_30, %c0_31] : memref<10x10x8xf32, #tpu.memory_space<vmem>>, vector<8x8x8xf32>
    %29 = vector.shape_cast %28 : vector<8x8x8xf32> to vector<64x8xf32>
    %30 = arith.truncf %29 : vector<64x8xf32> to vector<64x8xbf16>
    %c3 = arith.constant 3 : index
    %c0_32 = arith.constant 0 : index
    %c0_33 = arith.constant 0 : index
    %31 = vector.load %arg2[%c3, %c0_32, %c0_33] : memref<9x8x16xbf16, #tpu.memory_space<vmem>>, vector<1x8x16xbf16>
    %32 = vector.shape_cast %31 : vector<1x8x16xbf16> to vector<8x16xbf16>
    %cst_34 = arith.constant dense<0.000000e+00> : vector<64x16xf32>
    %33 = tpu.matmul %30, %32, %cst_34 {dimension_numbers = #tpu.dot_dimension_numbers<[1], [0], [0], [1], [0, 0, 1, 1], [], []>} : vector<64x8xbf16>, vector<8x16xbf16>, vector<64x16xf32> -> vector<64x16xf32>
    %34 = arith.addf %27, %33 : vector<64x16xf32>
    %c1_35 = arith.constant 1 : index
    %c1_36 = arith.constant 1 : index
    %c0_37 = arith.constant 0 : index
    %35 = vector.load %arg4[%c1_35, %c1_36, %c0_37] : memref<10x10x8xf32, #tpu.memory_space<vmem>>, vector<8x8x8xf32>
    %36 = vector.shape_cast %35 : vector<8x8x8xf32> to vector<64x8xf32>
    %37 = arith.truncf %36 : vector<64x8xf32> to vector<64x8xbf16>
    %c4 = arith.constant 4 : index
    %c0_38 = arith.constant 0 : index
    %c0_39 = arith.constant 0 : index
    %38 = vector.load %arg2[%c4, %c0_38, %c0_39] : memref<9x8x16xbf16, #tpu.memory_space<vmem>>, vector<1x8x16xbf16>
    %39 = vector.shape_cast %38 : vector<1x8x16xbf16> to vector<8x16xbf16>
    %cst_40 = arith.constant dense<0.000000e+00> : vector<64x16xf32>
    %40 = tpu.matmul %37, %39, %cst_40 {dimension_numbers = #tpu.dot_dimension_numbers<[1], [0], [0], [1], [0, 0, 1, 1], [], []>} : vector<64x8xbf16>, vector<8x16xbf16>, vector<64x16xf32> -> vector<64x16xf32>
    %41 = arith.addf %34, %40 : vector<64x16xf32>
    %c1_41 = arith.constant 1 : index
    %c2_42 = arith.constant 2 : index
    %c0_43 = arith.constant 0 : index
    %42 = vector.load %arg4[%c1_41, %c2_42, %c0_43] : memref<10x10x8xf32, #tpu.memory_space<vmem>>, vector<8x8x8xf32>
    %43 = vector.shape_cast %42 : vector<8x8x8xf32> to vector<64x8xf32>
    %44 = arith.truncf %43 : vector<64x8xf32> to vector<64x8xbf16>
    %c5 = arith.constant 5 : index
    %c0_44 = arith.constant 0 : index
    %c0_45 = arith.constant 0 : index
    %45 = vector.load %arg2[%c5, %c0_44, %c0_45] : memref<9x8x16xbf16, #tpu.memory_space<vmem>>, vector<1x8x16xbf16>
    %46 = vector.shape_cast %45 : vector<1x8x16xbf16> to vector<8x16xbf16>
    %cst_46 = arith.constant dense<0.000000e+00> : vector<64x16xf32>
    %47 = tpu.matmul %44, %46, %cst_46 {dimension_numbers = #tpu.dot_dimension_numbers<[1], [0], [0], [1], [0, 0, 1, 1], [], []>} : vector<64x8xbf16>, vector<8x16xbf16>, vector<64x16xf32> -> vector<64x16xf32>
    %48 = arith.addf %41, %47 : vector<64x16xf32>
    %c2_47 = arith.constant 2 : index
    %c0_48 = arith.constant 0 : index
    %c0_49 = arith.constant 0 : index
    %49 = vector.load %arg4[%c2_47, %c0_48, %c0_49] : memref<10x10x8xf32, #tpu.memory_space<vmem>>, vector<8x8x8xf32>
    %50 = vector.shape_cast %49 : vector<8x8x8xf32> to vector<64x8xf32>
    %51 = arith.truncf %50 : vector<64x8xf32> to vector<64x8xbf16>
    %c6 = arith.constant 6 : index
    %c0_50 = arith.constant 0 : index
    %c0_51 = arith.constant 0 : index
    %52 = vector.load %arg2[%c6, %c0_50, %c0_51] : memref<9x8x16xbf16, #tpu.memory_space<vmem>>, vector<1x8x16xbf16>
    %53 = vector.shape_cast %52 : vector<1x8x16xbf16> to vector<8x16xbf16>
    %cst_52 = arith.constant dense<0.000000e+00> : vector<64x16xf32>
    %54 = tpu.matmul %51, %53, %cst_52 {dimension_numbers = #tpu.dot_dimension_numbers<[1], [0], [0], [1], [0, 0, 1, 1], [], []>} : vector<64x8xbf16>, vector<8x16xbf16>, vector<64x16xf32> -> vector<64x16xf32>
    %55 = arith.addf %48, %54 : vector<64x16xf32>
    %c2_53 = arith.constant 2 : index
    %c1_54 = arith.constant 1 : index
    %c0_55 = arith.constant 0 : index
    %56 = vector.load %arg4[%c2_53, %c1_54, %c0_55] : memref<10x10x8xf32, #tpu.memory_space<vmem>>, vector<8x8x8xf32>
    %57 = vector.shape_cast %56 : vector<8x8x8xf32> to vector<64x8xf32>
    %58 = arith.truncf %57 : vector<64x8xf32> to vector<64x8xbf16>
    %c7 = arith.constant 7 : index
    %c0_56 = arith.constant 0 : index
    %c0_57 = arith.constant 0 : index
    %59 = vector.load %arg2[%c7, %c0_56, %c0_57] : memref<9x8x16xbf16, #tpu.memory_space<vmem>>, vector<1x8x16xbf16>
    %60 = vector.shape_cast %59 : vector<1x8x16xbf16> to vector<8x16xbf16>
    %cst_58 = arith.constant dense<0.000000e+00> : vector<64x16xf32>
    %61 = tpu.matmul %58, %60, %cst_58 {dimension_numbers = #tpu.dot_dimension_numbers<[1], [0], [0], [1], [0, 0, 1, 1], [], []>} : vector<64x8xbf16>, vector<8x16xbf16>, vector<64x16xf32> -> vector<64x16xf32>
    %62 = arith.addf %55, %61 : vector<64x16xf32>
    %c2_59 = arith.constant 2 : index
    %c2_60 = arith.constant 2 : index
    %c0_61 = arith.constant 0 : index
    %63 = vector.load %arg4[%c2_59, %c2_60, %c0_61] : memref<10x10x8xf32, #tpu.memory_space<vmem>>, vector<8x8x8xf32>
    %64 = vector.shape_cast %63 : vector<8x8x8xf32> to vector<64x8xf32>
    %65 = arith.truncf %64 : vector<64x8xf32> to vector<64x8xbf16>
    %c8 = arith.constant 8 : index
    %c0_62 = arith.constant 0 : index
    %c0_63 = arith.constant 0 : index
    %66 = vector.load %arg2[%c8, %c0_62, %c0_63] : memref<9x8x16xbf16, #tpu.memory_space<vmem>>, vector<1x8x16xbf16>
    %67 = vector.shape_cast %66 : vector<1x8x16xbf16> to vector<8x16xbf16>
    %cst_64 = arith.constant dense<0.000000e+00> : vector<64x16xf32>
    %68 = tpu.matmul %65, %67, %cst_64 {dimension_numbers = #tpu.dot_dimension_numbers<[1], [0], [0], [1], [0, 0, 1, 1], [], []>} : vector<64x8xbf16>, vector<8x16xbf16>, vector<64x16xf32> -> vector<64x16xf32>
    %69 = arith.addf %62, %68 : vector<64x16xf32>
    %cst_65 = arith.constant dense<0.000000e+00> : vector<16xf32>
    %70 = vector.multi_reduction <add>, %69, %cst_65 [0] : vector<64x16xf32> to vector<16xf32>
    %71 = vector.shape_cast %70 : vector<16xf32> to vector<1x16xf32>
    %72 = arith.mulf %69, %69 : vector<64x16xf32>
    %cst_66 = arith.constant dense<0.000000e+00> : vector<16xf32>
    %73 = vector.multi_reduction <add>, %72, %cst_66 [0] : vector<64x16xf32> to vector<16xf32>
    %74 = vector.shape_cast %73 : vector<16xf32> to vector<1x16xf32>
    %75 = vector.extract_strided_slice %71 {offsets = [0, 0], sizes = [1, 4], strides = [1, 1]} : vector<1x16xf32> to vector<1x4xf32>
    %76 = vector.extract_strided_slice %71 {offsets = [0, 4], sizes = [1, 4], strides = [1, 1]} : vector<1x16xf32> to vector<1x4xf32>
    %77 = arith.addf %75, %76 : vector<1x4xf32>
    %78 = vector.extract_strided_slice %71 {offsets = [0, 8], sizes = [1, 4], strides = [1, 1]} : vector<1x16xf32> to vector<1x4xf32>
    %79 = arith.addf %77, %78 : vector<1x4xf32>
    %80 = vector.extract_strided_slice %71 {offsets = [0, 12], sizes = [1, 4], strides = [1, 1]} : vector<1x16xf32> to vector<1x4xf32>
    %81 = arith.addf %79, %80 : vector<1x4xf32>
    %82 = vector.extract_strided_slice %74 {offsets = [0, 0], sizes = [1, 4], strides = [1, 1]} : vector<1x16xf32> to vector<1x4xf32>
    %83 = vector.extract_strided_slice %74 {offsets = [0, 4], sizes = [1, 4], strides = [1, 1]} : vector<1x16xf32> to vector<1x4xf32>
    %84 = arith.addf %82, %83 : vector<1x4xf32>
    %85 = vector.extract_strided_slice %74 {offsets = [0, 8], sizes = [1, 4], strides = [1, 1]} : vector<1x16xf32> to vector<1x4xf32>
    %86 = arith.addf %84, %85 : vector<1x4xf32>
    %87 = vector.extract_strided_slice %74 {offsets = [0, 12], sizes = [1, 4], strides = [1, 1]} : vector<1x16xf32> to vector<1x4xf32>
    %88 = arith.addf %86, %87 : vector<1x4xf32>
    %cst_67 = arith.constant 3.906250e-03 : f32
    %89 = vector.broadcast %cst_67 : f32 to vector<1x4xf32>
    %90 = arith.mulf %81, %89 : vector<1x4xf32>
    %cst_68 = arith.constant 3.906250e-03 : f32
    %91 = vector.broadcast %cst_68 : f32 to vector<1x4xf32>
    %92 = arith.mulf %88, %91 : vector<1x4xf32>
    %93 = arith.mulf %90, %90 : vector<1x4xf32>
    %94 = arith.subf %92, %93 : vector<1x4xf32>
    %cst_69 = arith.constant 9.99999974E-6 : f32
    %95 = vector.broadcast %cst_69 : f32 to vector<1x4xf32>
    %96 = arith.addf %94, %95 : vector<1x4xf32>
    %97 = math.rsqrt %96 : vector<1x4xf32>
    %98 = tpu.concatenate %90, %90, %90, %90 in 1 : vector<1x4xf32>, vector<1x4xf32>, vector<1x4xf32>, vector<1x4xf32> -> vector<1x16xf32>
    %99 = tpu.concatenate %97, %97, %97, %97 in 1 : vector<1x4xf32>, vector<1x4xf32>, vector<1x4xf32>, vector<1x4xf32> -> vector<1x16xf32>
    %100 = vector.broadcast %98 : vector<1x16xf32> to vector<64x16xf32>
    %101 = arith.subf %69, %100 : vector<64x16xf32>
    %102 = vector.broadcast %99 : vector<1x16xf32> to vector<64x16xf32>
    %103 = arith.mulf %101, %102 : vector<64x16xf32>
    %cst_70 = arith.constant 0.000000e+00 : f32
    %104 = vector.broadcast %cst_70 : f32 to vector<64x16xf32>
    %105 = arith.maximumf %103, %104 : vector<64x16xf32>
    %c0_71 = arith.constant 0 : index
    %c0_72 = arith.constant 0 : index
    %c0_73 = arith.constant 0 : index
    %106 = vector.load %arg3[%c0_71, %c0_72, %c0_73] : memref<2x64x16xf32, #tpu.memory_space<vmem>>, vector<1x64x16xf32>
    %107 = vector.shape_cast %106 : vector<1x64x16xf32> to vector<64x16xf32>
    %108 = vector.shape_cast %105 : vector<64x16xf32> to vector<1x64x16xf32>
    tpu.vector_store %arg3[%c0_71, %c0_72, %c0_73], %108 {strides = array<i32>} : memref<2x64x16xf32, #tpu.memory_space<vmem>>, vector<1x64x16xf32>,
    %c1_74 = arith.constant 1 : index
    %c0_75 = arith.constant 0 : index
    %c0_76 = arith.constant 0 : index
    %c0_77 = arith.constant 0 : index
    %109 = vector.load %arg1[%c1_74, %c0_75, %c0_76, %c0_77] : memref<2x8x8x8xbf16, #tpu.memory_space<vmem>>, vector<1x8x8x8xbf16>
    %110 = vector.shape_cast %109 : vector<1x8x8x8xbf16> to vector<8x8x8xbf16>
    %111 = arith.extf %110 : vector<8x8x8xbf16> to vector<8x8x8xf32>
    %c1_78 = arith.constant 1 : index
    %c1_79 = arith.constant 1 : index
    %c0_80 = arith.constant 0 : index
    %112 = vector.load %arg4[%c1_78, %c1_79, %c0_80] : memref<10x10x8xf32, #tpu.memory_space<vmem>>, vector<8x8x8xf32>
    tpu.vector_store %arg4[%c1_78, %c1_79, %c0_80], %111 {strides = array<i32>} : memref<10x10x8xf32, #tpu.memory_space<vmem>>, vector<8x8x8xf32>,
    %cst_81 = arith.constant 0.000000e+00 : f32
    %113 = vector.broadcast %cst_81 : f32 to vector<64x16xf32>
    %c0_82 = arith.constant 0 : index
    %c0_83 = arith.constant 0 : index
    %c0_84 = arith.constant 0 : index
    %114 = vector.load %arg4[%c0_82, %c0_83, %c0_84] : memref<10x10x8xf32, #tpu.memory_space<vmem>>, vector<8x8x8xf32>
    %115 = vector.shape_cast %114 : vector<8x8x8xf32> to vector<64x8xf32>
    %116 = arith.truncf %115 : vector<64x8xf32> to vector<64x8xbf16>
    %c0_85 = arith.constant 0 : index
    %c0_86 = arith.constant 0 : index
    %c0_87 = arith.constant 0 : index
    %117 = vector.load %arg2[%c0_85, %c0_86, %c0_87] : memref<9x8x16xbf16, #tpu.memory_space<vmem>>, vector<1x8x16xbf16>
    %118 = vector.shape_cast %117 : vector<1x8x16xbf16> to vector<8x16xbf16>
    %cst_88 = arith.constant dense<0.000000e+00> : vector<64x16xf32>
    %119 = tpu.matmul %116, %118, %cst_88 {dimension_numbers = #tpu.dot_dimension_numbers<[1], [0], [0], [1], [0, 0, 1, 1], [], []>} : vector<64x8xbf16>, vector<8x16xbf16>, vector<64x16xf32> -> vector<64x16xf32>
    %120 = arith.addf %113, %119 : vector<64x16xf32>
    %c0_89 = arith.constant 0 : index
    %c1_90 = arith.constant 1 : index
    %c0_91 = arith.constant 0 : index
    %121 = vector.load %arg4[%c0_89, %c1_90, %c0_91] : memref<10x10x8xf32, #tpu.memory_space<vmem>>, vector<8x8x8xf32>
    %122 = vector.shape_cast %121 : vector<8x8x8xf32> to vector<64x8xf32>
    %123 = arith.truncf %122 : vector<64x8xf32> to vector<64x8xbf16>
    %c1_92 = arith.constant 1 : index
    %c0_93 = arith.constant 0 : index
    %c0_94 = arith.constant 0 : index
    %124 = vector.load %arg2[%c1_92, %c0_93, %c0_94] : memref<9x8x16xbf16, #tpu.memory_space<vmem>>, vector<1x8x16xbf16>
    %125 = vector.shape_cast %124 : vector<1x8x16xbf16> to vector<8x16xbf16>
    %cst_95 = arith.constant dense<0.000000e+00> : vector<64x16xf32>
    %126 = tpu.matmul %123, %125, %cst_95 {dimension_numbers = #tpu.dot_dimension_numbers<[1], [0], [0], [1], [0, 0, 1, 1], [], []>} : vector<64x8xbf16>, vector<8x16xbf16>, vector<64x16xf32> -> vector<64x16xf32>
    %127 = arith.addf %120, %126 : vector<64x16xf32>
    %c0_96 = arith.constant 0 : index
    %c2_97 = arith.constant 2 : index
    %c0_98 = arith.constant 0 : index
    %128 = vector.load %arg4[%c0_96, %c2_97, %c0_98] : memref<10x10x8xf32, #tpu.memory_space<vmem>>, vector<8x8x8xf32>
    %129 = vector.shape_cast %128 : vector<8x8x8xf32> to vector<64x8xf32>
    %130 = arith.truncf %129 : vector<64x8xf32> to vector<64x8xbf16>
    %c2_99 = arith.constant 2 : index
    %c0_100 = arith.constant 0 : index
    %c0_101 = arith.constant 0 : index
    %131 = vector.load %arg2[%c2_99, %c0_100, %c0_101] : memref<9x8x16xbf16, #tpu.memory_space<vmem>>, vector<1x8x16xbf16>
    %132 = vector.shape_cast %131 : vector<1x8x16xbf16> to vector<8x16xbf16>
    %cst_102 = arith.constant dense<0.000000e+00> : vector<64x16xf32>
    %133 = tpu.matmul %130, %132, %cst_102 {dimension_numbers = #tpu.dot_dimension_numbers<[1], [0], [0], [1], [0, 0, 1, 1], [], []>} : vector<64x8xbf16>, vector<8x16xbf16>, vector<64x16xf32> -> vector<64x16xf32>
    %134 = arith.addf %127, %133 : vector<64x16xf32>
    %c1_103 = arith.constant 1 : index
    %c0_104 = arith.constant 0 : index
    %c0_105 = arith.constant 0 : index
    %135 = vector.load %arg4[%c1_103, %c0_104, %c0_105] : memref<10x10x8xf32, #tpu.memory_space<vmem>>, vector<8x8x8xf32>
    %136 = vector.shape_cast %135 : vector<8x8x8xf32> to vector<64x8xf32>
    %137 = arith.truncf %136 : vector<64x8xf32> to vector<64x8xbf16>
    %c3_106 = arith.constant 3 : index
    %c0_107 = arith.constant 0 : index
    %c0_108 = arith.constant 0 : index
    %138 = vector.load %arg2[%c3_106, %c0_107, %c0_108] : memref<9x8x16xbf16, #tpu.memory_space<vmem>>, vector<1x8x16xbf16>
    %139 = vector.shape_cast %138 : vector<1x8x16xbf16> to vector<8x16xbf16>
    %cst_109 = arith.constant dense<0.000000e+00> : vector<64x16xf32>
    %140 = tpu.matmul %137, %139, %cst_109 {dimension_numbers = #tpu.dot_dimension_numbers<[1], [0], [0], [1], [0, 0, 1, 1], [], []>} : vector<64x8xbf16>, vector<8x16xbf16>, vector<64x16xf32> -> vector<64x16xf32>
    %141 = arith.addf %134, %140 : vector<64x16xf32>
    %c1_110 = arith.constant 1 : index
    %c1_111 = arith.constant 1 : index
    %c0_112 = arith.constant 0 : index
    %142 = vector.load %arg4[%c1_110, %c1_111, %c0_112] : memref<10x10x8xf32, #tpu.memory_space<vmem>>, vector<8x8x8xf32>
    %143 = vector.shape_cast %142 : vector<8x8x8xf32> to vector<64x8xf32>
    %144 = arith.truncf %143 : vector<64x8xf32> to vector<64x8xbf16>
    %c4_113 = arith.constant 4 : index
    %c0_114 = arith.constant 0 : index
    %c0_115 = arith.constant 0 : index
    %145 = vector.load %arg2[%c4_113, %c0_114, %c0_115] : memref<9x8x16xbf16, #tpu.memory_space<vmem>>, vector<1x8x16xbf16>
    %146 = vector.shape_cast %145 : vector<1x8x16xbf16> to vector<8x16xbf16>
    %cst_116 = arith.constant dense<0.000000e+00> : vector<64x16xf32>
    %147 = tpu.matmul %144, %146, %cst_116 {dimension_numbers = #tpu.dot_dimension_numbers<[1], [0], [0], [1], [0, 0, 1, 1], [], []>} : vector<64x8xbf16>, vector<8x16xbf16>, vector<64x16xf32> -> vector<64x16xf32>
    %148 = arith.addf %141, %147 : vector<64x16xf32>
    %c1_117 = arith.constant 1 : index
    %c2_118 = arith.constant 2 : index
    %c0_119 = arith.constant 0 : index
    %149 = vector.load %arg4[%c1_117, %c2_118, %c0_119] : memref<10x10x8xf32, #tpu.memory_space<vmem>>, vector<8x8x8xf32>
    %150 = vector.shape_cast %149 : vector<8x8x8xf32> to vector<64x8xf32>
    %151 = arith.truncf %150 : vector<64x8xf32> to vector<64x8xbf16>
    %c5_120 = arith.constant 5 : index
    %c0_121 = arith.constant 0 : index
    %c0_122 = arith.constant 0 : index
    %152 = vector.load %arg2[%c5_120, %c0_121, %c0_122] : memref<9x8x16xbf16, #tpu.memory_space<vmem>>, vector<1x8x16xbf16>
    %153 = vector.shape_cast %152 : vector<1x8x16xbf16> to vector<8x16xbf16>
    %cst_123 = arith.constant dense<0.000000e+00> : vector<64x16xf32>
    %154 = tpu.matmul %151, %153, %cst_123 {dimension_numbers = #tpu.dot_dimension_numbers<[1], [0], [0], [1], [0, 0, 1, 1], [], []>} : vector<64x8xbf16>, vector<8x16xbf16>, vector<64x16xf32> -> vector<64x16xf32>
    %155 = arith.addf %148, %154 : vector<64x16xf32>
    %c2_124 = arith.constant 2 : index
    %c0_125 = arith.constant 0 : index
    %c0_126 = arith.constant 0 : index
    %156 = vector.load %arg4[%c2_124, %c0_125, %c0_126] : memref<10x10x8xf32, #tpu.memory_space<vmem>>, vector<8x8x8xf32>
    %157 = vector.shape_cast %156 : vector<8x8x8xf32> to vector<64x8xf32>
    %158 = arith.truncf %157 : vector<64x8xf32> to vector<64x8xbf16>
    %c6_127 = arith.constant 6 : index
    %c0_128 = arith.constant 0 : index
    %c0_129 = arith.constant 0 : index
    %159 = vector.load %arg2[%c6_127, %c0_128, %c0_129] : memref<9x8x16xbf16, #tpu.memory_space<vmem>>, vector<1x8x16xbf16>
    %160 = vector.shape_cast %159 : vector<1x8x16xbf16> to vector<8x16xbf16>
    %cst_130 = arith.constant dense<0.000000e+00> : vector<64x16xf32>
    %161 = tpu.matmul %158, %160, %cst_130 {dimension_numbers = #tpu.dot_dimension_numbers<[1], [0], [0], [1], [0, 0, 1, 1], [], []>} : vector<64x8xbf16>, vector<8x16xbf16>, vector<64x16xf32> -> vector<64x16xf32>
    %162 = arith.addf %155, %161 : vector<64x16xf32>
    %c2_131 = arith.constant 2 : index
    %c1_132 = arith.constant 1 : index
    %c0_133 = arith.constant 0 : index
    %163 = vector.load %arg4[%c2_131, %c1_132, %c0_133] : memref<10x10x8xf32, #tpu.memory_space<vmem>>, vector<8x8x8xf32>
    %164 = vector.shape_cast %163 : vector<8x8x8xf32> to vector<64x8xf32>
    %165 = arith.truncf %164 : vector<64x8xf32> to vector<64x8xbf16>
    %c7_134 = arith.constant 7 : index
    %c0_135 = arith.constant 0 : index
    %c0_136 = arith.constant 0 : index
    %166 = vector.load %arg2[%c7_134, %c0_135, %c0_136] : memref<9x8x16xbf16, #tpu.memory_space<vmem>>, vector<1x8x16xbf16>
    %167 = vector.shape_cast %166 : vector<1x8x16xbf16> to vector<8x16xbf16>
    %cst_137 = arith.constant dense<0.000000e+00> : vector<64x16xf32>
    %168 = tpu.matmul %165, %167, %cst_137 {dimension_numbers = #tpu.dot_dimension_numbers<[1], [0], [0], [1], [0, 0, 1, 1], [], []>} : vector<64x8xbf16>, vector<8x16xbf16>, vector<64x16xf32> -> vector<64x16xf32>
    %169 = arith.addf %162, %168 : vector<64x16xf32>
    %c2_138 = arith.constant 2 : index
    %c2_139 = arith.constant 2 : index
    %c0_140 = arith.constant 0 : index
    %170 = vector.load %arg4[%c2_138, %c2_139, %c0_140] : memref<10x10x8xf32, #tpu.memory_space<vmem>>, vector<8x8x8xf32>
    %171 = vector.shape_cast %170 : vector<8x8x8xf32> to vector<64x8xf32>
    %172 = arith.truncf %171 : vector<64x8xf32> to vector<64x8xbf16>
    %c8_141 = arith.constant 8 : index
    %c0_142 = arith.constant 0 : index
    %c0_143 = arith.constant 0 : index
    %173 = vector.load %arg2[%c8_141, %c0_142, %c0_143] : memref<9x8x16xbf16, #tpu.memory_space<vmem>>, vector<1x8x16xbf16>
    %174 = vector.shape_cast %173 : vector<1x8x16xbf16> to vector<8x16xbf16>
    %cst_144 = arith.constant dense<0.000000e+00> : vector<64x16xf32>
    %175 = tpu.matmul %172, %174, %cst_144 {dimension_numbers = #tpu.dot_dimension_numbers<[1], [0], [0], [1], [0, 0, 1, 1], [], []>} : vector<64x8xbf16>, vector<8x16xbf16>, vector<64x16xf32> -> vector<64x16xf32>
    %176 = arith.addf %169, %175 : vector<64x16xf32>
    %cst_145 = arith.constant dense<0.000000e+00> : vector<16xf32>
    %177 = vector.multi_reduction <add>, %176, %cst_145 [0] : vector<64x16xf32> to vector<16xf32>
    %178 = vector.shape_cast %177 : vector<16xf32> to vector<1x16xf32>
    %179 = arith.mulf %176, %176 : vector<64x16xf32>
    %cst_146 = arith.constant dense<0.000000e+00> : vector<16xf32>
    %180 = vector.multi_reduction <add>, %179, %cst_146 [0] : vector<64x16xf32> to vector<16xf32>
    %181 = vector.shape_cast %180 : vector<16xf32> to vector<1x16xf32>
    %182 = vector.extract_strided_slice %178 {offsets = [0, 0], sizes = [1, 4], strides = [1, 1]} : vector<1x16xf32> to vector<1x4xf32>
    %183 = vector.extract_strided_slice %178 {offsets = [0, 4], sizes = [1, 4], strides = [1, 1]} : vector<1x16xf32> to vector<1x4xf32>
    %184 = arith.addf %182, %183 : vector<1x4xf32>
    %185 = vector.extract_strided_slice %178 {offsets = [0, 8], sizes = [1, 4], strides = [1, 1]} : vector<1x16xf32> to vector<1x4xf32>
    %186 = arith.addf %184, %185 : vector<1x4xf32>
    %187 = vector.extract_strided_slice %178 {offsets = [0, 12], sizes = [1, 4], strides = [1, 1]} : vector<1x16xf32> to vector<1x4xf32>
    %188 = arith.addf %186, %187 : vector<1x4xf32>
    %189 = vector.extract_strided_slice %181 {offsets = [0, 0], sizes = [1, 4], strides = [1, 1]} : vector<1x16xf32> to vector<1x4xf32>
    %190 = vector.extract_strided_slice %181 {offsets = [0, 4], sizes = [1, 4], strides = [1, 1]} : vector<1x16xf32> to vector<1x4xf32>
    %191 = arith.addf %189, %190 : vector<1x4xf32>
    %192 = vector.extract_strided_slice %181 {offsets = [0, 8], sizes = [1, 4], strides = [1, 1]} : vector<1x16xf32> to vector<1x4xf32>
    %193 = arith.addf %191, %192 : vector<1x4xf32>
    %194 = vector.extract_strided_slice %181 {offsets = [0, 12], sizes = [1, 4], strides = [1, 1]} : vector<1x16xf32> to vector<1x4xf32>
    %195 = arith.addf %193, %194 : vector<1x4xf32>
    %cst_147 = arith.constant 3.906250e-03 : f32
    %196 = vector.broadcast %cst_147 : f32 to vector<1x4xf32>
    %197 = arith.mulf %188, %196 : vector<1x4xf32>
    %cst_148 = arith.constant 3.906250e-03 : f32
    %198 = vector.broadcast %cst_148 : f32 to vector<1x4xf32>
    %199 = arith.mulf %195, %198 : vector<1x4xf32>
    %200 = arith.mulf %197, %197 : vector<1x4xf32>
    %201 = arith.subf %199, %200 : vector<1x4xf32>
    %cst_149 = arith.constant 9.99999974E-6 : f32
    %202 = vector.broadcast %cst_149 : f32 to vector<1x4xf32>
    %203 = arith.addf %201, %202 : vector<1x4xf32>
    %204 = math.rsqrt %203 : vector<1x4xf32>
    %205 = tpu.concatenate %197, %197, %197, %197 in 1 : vector<1x4xf32>, vector<1x4xf32>, vector<1x4xf32>, vector<1x4xf32> -> vector<1x16xf32>
    %206 = tpu.concatenate %204, %204, %204, %204 in 1 : vector<1x4xf32>, vector<1x4xf32>, vector<1x4xf32>, vector<1x4xf32> -> vector<1x16xf32>
    %207 = vector.broadcast %205 : vector<1x16xf32> to vector<64x16xf32>
    %208 = arith.subf %176, %207 : vector<64x16xf32>
    %209 = vector.broadcast %206 : vector<1x16xf32> to vector<64x16xf32>
    %210 = arith.mulf %208, %209 : vector<64x16xf32>
    %cst_150 = arith.constant 0.000000e+00 : f32
    %211 = vector.broadcast %cst_150 : f32 to vector<64x16xf32>
    %212 = arith.maximumf %210, %211 : vector<64x16xf32>
    %c1_151 = arith.constant 1 : index
    %c0_152 = arith.constant 0 : index
    %c0_153 = arith.constant 0 : index
    %213 = vector.load %arg3[%c1_151, %c0_152, %c0_153] : memref<2x64x16xf32, #tpu.memory_space<vmem>>, vector<1x64x16xf32>
    %214 = vector.shape_cast %213 : vector<1x64x16xf32> to vector<64x16xf32>
    %215 = vector.shape_cast %212 : vector<64x16xf32> to vector<1x64x16xf32>
    tpu.vector_store %arg3[%c1_151, %c0_152, %c0_153], %215 {strides = array<i32>} : memref<2x64x16xf32, #tpu.memory_space<vmem>>, vector<1x64x16xf32>,
    return
  }
  func.func @transform_0(%arg0: i32) -> (i32, i32, i32, i32) {
    %c0_i32 = arith.constant 0 : i32
    %c0_i32_0 = arith.constant 0 : i32
    %c0_i32_1 = arith.constant 0 : i32
    %c0_i32_2 = arith.constant 0 : i32
    %c0_i32_3 = arith.constant 0 : i32
    return %c0_i32, %c0_i32_0, %c0_i32_1, %c0_i32_2 : i32, i32, i32, i32
  }
  func.func @transform_1(%arg0: i32) -> (i32, i32, i32) {
    %c0_i32 = arith.constant 0 : i32
    %c0_i32_0 = arith.constant 0 : i32
    %c0_i32_1 = arith.constant 0 : i32
    %c0_i32_2 = arith.constant 0 : i32
    return %c0_i32, %c0_i32_0, %c0_i32_1 : i32, i32, i32
  }
  func.func @transform_2(%arg0: i32) -> (i32, i32, i32) {
    %c0_i32 = arith.constant 0 : i32
    %c0_i32_0 = arith.constant 0 : i32
    %c0_i32_1 = arith.constant 0 : i32
    %c0_i32_2 = arith.constant 0 : i32
    return %c0_i32, %c0_i32_0, %c0_i32_1 : i32, i32, i32
  }
}

</mosaic_0001>

<bundles_post_ra>
// kernel: tpu_custom_call.1
= control target key start
LH: loop header
LB: loop body
LE: loop exit
PB: predicated region body
PF: predicated region fallthrough
CT: control target
= control target key end

     0   :  { %7 = vsyncpa [#allocation4], 0  ;;  %s3496_s0 = inlined_call_operand.hbm [shape: bf16[2,8,8,8], index: 0, kind: input, shape index: {}]   ;;  %s3497_s1 = inlined_call_operand.hbm [shape: bf16[9,8,16], index: 1, kind: input, shape index: {}]   ;;  %s3498_s2 = inlined_call_operand.vmem [shape: f32[2,64,16], index: 2, kind: output, shape index: {}]  }
   0x1   :  { %8 = vsyncpa [#allocation6], 0  ;;  %s2810_s9 = smov [#allocation3]   ;;  %s2762_s13 = scalar_lea.hbm %s3496_s0, 1024 }
   0x2   :  { %s14_s10 = sshll.u32 %s2810_s9, 4  ;;  %p2763_p0 = scmp.ne.s32.totalorder %s3496_s0, %s2762_s13  ;;  %s15_s10 = int_to_ptr.vmem [resolvable:$true] %s14_s10 }
   0x3   :  { %p2766_p1 = scmp.lt.u32.totalorder %s2762_s13, %s3496_s0 }
   0x5   :  { %p2768_p2 = pnand %p2766_p1, %p2763_p0 }
   0x7   :  { %2771 = shalt.err (!%p2768_p2)
}
   0x8   :  { %s2772_s18 = scalar_lea.vmem %s15_s10, 1024  ;;  %p2777_p4 = scmp.lt.s32.totalorder %s15_s10, %s15_s10 }
   0x9   :  { %p2773_p3 = scmp.ne.s32.totalorder %s15_s10, %s2772_s18  ;;  %p2778_p5 = scmp.lt.s32.totalorder %s2772_s18, %s2772_s18 }
   0xb   :  { %p2779_p6 = por %p2778_p5, %p2777_p4 }
   0xd   :  { %p2780_p7 = pnand %p2779_p6, %p2773_p3 }
   0xf   :  { %2783 = shalt.err (!%p2780_p7)
}
  0x10   :  { %s2811_s19 = smov 64   ;;  %s2812_s20 = smov 4  }
  0x11   :  { %20 = dma.hbm_to_vmem [thread:$0]  %s3496_s0, 1024, %s15_s10, [#allocation4], %s2811_s19, %s2811_s19, %s2812_s20  }
  0x12   :  { %s2813_s23 = smov [#allocation5]   ;;  %s2784_s27 = scalar_lea.hbm %s3497_s1, 576 }
  0x13   :  { %s26_s24 = sshll.u32 %s2813_s23, 4  ;;  %p2785_p8 = scmp.ne.s32.totalorder %s3497_s1, %s2784_s27  ;;  %s27_s24 = int_to_ptr.vmem [resolvable:$true] %s26_s24 }
  0x14   :  { %p2788_p9 = scmp.lt.u32.totalorder %s2784_s27, %s3497_s1 }
  0x16   :  { %p2790_p10 = pnand %p2788_p9, %p2785_p8 }
  0x18   :  { %2793 = shalt.err (!%p2790_p10)
}
  0x19   :  { %s2794_s4 = scalar_lea.vmem %s27_s24, 576  ;;  %p2799_p12 = scmp.lt.s32.totalorder %s27_s24, %s27_s24 }
  0x1a   :  { %p2795_p11 = scmp.ne.s32.totalorder %s27_s24, %s2794_s4  ;;  %p2800_p13 = scmp.lt.s32.totalorder %s2794_s4, %s2794_s4 }
  0x1c   :  { %p2801_p0 = por %p2800_p13, %p2799_p12 }
  0x1e   :  { %p2802_p1 = pnand %p2801_p0, %p2795_p11 }
  0x20   :  { %2805 = shalt.err (!%p2802_p1)
}
  0x21   :  { %32 = dma.hbm_to_vmem [thread:$0]  %s3497_s1, 576, %s27_s24, [#allocation6], %s2811_s19, %s2811_s19, %s2812_s20  }
  0x22   :  { %2806 = dma.done.wait [#allocation4], 1024  }
  0x23   :  { %2807 = vsyncadd [#allocation4], 4294966272 }
  0x24   :  { %2808 = dma.done.wait [#allocation6], 576  }
  0x25   :  { %2809 = vsyncadd [#allocation6], 4294966720  ;;  %vm40_vm0 = vcmask 64512   ;;  %vm42_vm1 = vcmask 58368   ;;  %v2814_v0 = vmov 0.0   ;;  %vm126_vm2 = vcmask 1043456  }
  0x26   :  { %41 = vst.msk [vmem:[#allocation2] sm:$0xff] %vm40_vm0, %v2814_v0  ;;  %44 = vst.msk [vmem:[#allocation2 + $0x10] sm:$0xff] %vm40_vm0, %v2814_v0  ;;  %v113_v1 = vld [vmem:[#allocation5 + $0x4] sm:$0xf]  ;;  %v99_v6 = vld [vmem:[#allocation5] sm:$0xf] }
  0x27   :  { %43 = vst.msk [vmem:[#allocation2 + $0x8] sm:$0x3] %vm42_vm1, %v2814_v0  ;;  %45 = vst.msk [vmem:[#allocation2 + $0x18] sm:$0x3] %vm42_vm1, %v2814_v0  ;;  %v2295_v2 = vld [vmem:[#allocation3] sm:$0xff]   ;;  %2730 = vmatprep.subr.msk.bf16.mxu0 %vm126_vm2, %v113_v1  ;;  %v128_v3 = vsel %vm126_vm2, %v113_v1, 0 }
  0x28   :  { %46 = vst.msk [vmem:[#allocation2 + $0x20] sm:$0xff] %vm40_vm0, %v2814_v0  ;;  %48 = vst.msk [vmem:[#allocation2 + $0x30] sm:$0xff] %vm40_vm0, %v2814_v0  ;;  %v2296_v4 = vunpack.c.l.bf16 %v2295_v2  ;;  %v2297_v5 = vunpack.c.h.bf16 %v2295_v2  ;;  %v2326_v7 = vld [vmem:[#allocation3 + $0x8] sm:$0xff]   ;;  %2423 = vmatpush3.bf16.msra.mxu0 %v128_v3  ;;  %v1191_v9 = vld [vmem:[#allocation5 + $0x4] sm:$0xf]  ;;  %v208_v39 = vsel %vm126_vm2, %v99_v6, 0 }
  0x29   :  { %47 = vst.msk [vmem:[#allocation2 + $0x28] sm:$0x3] %vm42_vm1, %v2814_v0  ;;  %49 = vst.msk [vmem:[#allocation2 + $0x38] sm:$0x3] %vm42_vm1, %v2814_v0  ;;  %v2300_v8 = vunpack.c.l.bf16 %v2326_v7  ;;  %v2301_v10 = vunpack.c.h.bf16 %v2326_v7  ;;  %v2327_v11 = vld [vmem:[#allocation3 + $0x10] sm:$0xff]   ;;  %2731 = vmatprep.subr.msk.bf16.mxu0 %vm126_vm2, %v99_v6  ;;  %2739 = vmatprep.subr.msk.bf16.mxu1 %vm126_vm2, %v1191_v9  ;;  %v1205_v13 = vsel %vm126_vm2, %v1191_v9, 0 }
  0x2a   :  { %50 = vst.msk [vmem:[#allocation2 + $0x40] sm:$0xff] %vm40_vm0, %v2814_v0  ;;  %52 = vst.msk [vmem:[#allocation2 + $0x50] sm:$0xff] %vm40_vm0, %v2814_v0  ;;  %v2883_v12 = vld [vmem:[#allocation5] sm:$0xf]  ;;  %v2304_v14 = vunpack.c.l.bf16 %v2327_v11  ;;  %v2305_v15 = vunpack.c.h.bf16 %v2327_v11  ;;  %v2328_v16 = vld [vmem:[#allocation3 + $0x18] sm:$0xff]   ;;  %2513 = vmatpush3.bf16.msra.mxu1 %v1205_v13  ;;  %vm990_vm3 = vcmask 130048  }
  0x2b   :  { %51 = vst.msk [vmem:[#allocation2 + $0x48] sm:$0x3] %vm42_vm1, %v2814_v0  ;;  %53 = vst.msk [vmem:[#allocation2 + $0x58] sm:$0x3] %vm42_vm1, %v2814_v0  ;;  %v2311_v17 = vld [vmem:[#allocation3 + $0x20] sm:$0xff]   ;;  %v2308_v18 = vunpack.c.l.bf16 %v2328_v16  ;;  %v2309_v19 = vunpack.c.h.bf16 %v2328_v16  ;;  %2740 = vmatprep.subr.msk.bf16.mxu1 %vm126_vm2, %v2883_v12  ;;  %v2329_v20 = vld [vmem:[#allocation3 + $0x28] sm:$0xff]  }
  0x2c   :  { %54 = vst.msk [vmem:[#allocation2 + $0x60] sm:$0xff] %vm40_vm0, %v2814_v0  ;;  %56 = vst.msk [vmem:[#allocation2 + $0x70] sm:$0xff] %vm40_vm0, %v2814_v0  ;;  %v2312_v21 = vunpack.c.l.bf16 %v2311_v17  ;;  %v2330_v23 = vld [vmem:[#allocation3 + $0x30] sm:$0xff]   ;;  %v2313_v24 = vunpack.c.h.bf16 %v2311_v17  ;;  %v2316_v25 = vunpack.c.l.bf16 %v2329_v20  ;;  %v2331_v26 = vld [vmem:[#allocation3 + $0x38] sm:$0xff]   ;;  %v2317_v34 = vunpack.c.h.bf16 %v2329_v20  ;;  %s2815_s1 = smov 120   ;;  %s2816_s6 = smov 124  }
  0x2d   :  { %55 = vst.msk [vmem:[#allocation2 + $0x68] sm:$0x3] %vm42_vm1, %v2814_v0  ;;  %57 = vst.msk [vmem:[#allocation2 + $0x78] sm:$0x3] %vm42_vm1, %v2814_v0  ;;  %v2320_v35 = vunpack.c.l.bf16 %v2330_v23  ;;  %v2922_v40 = vld [vmem:[#allocation5 + $0x8] sm:$0xf]  ;;  %v2321_v45 = vunpack.c.h.bf16 %v2330_v23  ;;  %v2324_v46 = vunpack.c.l.bf16 %v2331_v26  ;;  %v2325_v51 = vunpack.c.h.bf16 %v2331_v26 }
  0x2e   :  { %58 = vst.msk [vmem:[#allocation2 + $0x80] sm:$0xff] %vm40_vm0, %v2814_v0  ;;  %60 = vst.msk [vmem:[#allocation2 + $0x90] sm:$0xff] %vm40_vm0, %v2814_v0  ;;  %v2898_v22 = vld [vmem:[#allocation2 + $0x1] sm:$0xff]  ;;  %v390_v23 = vld [vmem:[#allocation5 + $0xc] sm:$0xf]  ;;  %s2817_s7 = smov 116  }
  0x2f   :  { %59 = vst.msk [vmem:[#allocation2 + $0x88] sm:$0x3] %vm42_vm1, %v2814_v0  ;;  %61 = vst.msk [vmem:[#allocation2 + $0x98] sm:$0x3] %vm42_vm1, %v2814_v0  ;;  %v87_v56 = vld [vmem:[#allocation2] sm:$0xff]  ;;  %s2818_s8 = smov 8  }
  0x30   :  { %79 = vst.msk [vmem:[#allocation2 + $0x11] sm:$0xff] %vm40_vm0, %v2296_v4  ;;  %80 = vst.msk [vmem:[#allocation2 + $0x21] sm:$0xff] %vm40_vm0, %v2297_v5  ;;  %v275_v26 = vld [vmem:[#allocation2 + $0x2] sm:$0xff]  ;;  %s2819_s9 = smov 12   ;;  %vm1083_vm4 = vcmask 31744   ;;  %vm1086_vm5 = vcmask 97280  }
  0x31   :  { %81 = vst.msk [vmem:[#allocation2 + $0x31] sm:$0xff] %vm40_vm0, %v2300_v8  ;;  %82 = vst.msk [vmem:[#allocation2 + $0x41] sm:$0xff] %vm40_vm0, %v2301_v10  ;;  %v1285_v10 = vsel %vm126_vm2, %v2883_v12, 0 }
  0x32   :  { %83 = vst.msk [vmem:[#allocation2 + $0x51] sm:$0xff] %vm40_vm0, %v2304_v14  ;;  %84 = vst.msk [vmem:[#allocation2 + $0x61] sm:$0xff] %vm40_vm0, %v2305_v15  ;;  %v1364_v14 = vld [vmem:[#allocation5 + $0x8] sm:$0xf] }
  0x33   :  { %85 = vst.msk [vmem:[#allocation2 + $0x71] sm:$0xff] %vm40_vm0, %v2308_v18  ;;  %86 = vst.msk [vmem:[#allocation2 + $0x81] sm:$0xff] %vm40_vm0, %v2309_v19 }
  0x37   :  { %v2900_v27 = vld [vmem:[#allocation2 + $0x10] sm:$0xff]  ;;  %v2909_v31 = vld [vmem:[#allocation2 + $0x20] sm:$0xff] }
  0x38   :  { %v2902_v28 = vld [vmem:[#allocation2 + $0x11] sm:$0xff]  ;;  %v2913_v33 = vld [vmem:[#allocation2 + $0x21] sm:$0xff]  ;;  %v95_v8 = vpack.c.bf16 %v2900_v27, %v87_v56  ;;  %v385_v47 = vpack.c.bf16 %v2909_v31, %v2900_v27 }
  0x39   :  { %v2904_v29 = vld [vmem:[#allocation2 + $0x12] sm:$0xff]  ;;  %v108_v30 = vpack.c.bf16 %v2902_v28, %v2898_v22  ;;  %v2917_v37 = vld [vmem:[#allocation2 + $0x22] sm:$0xff] }
  0x3a   :  { %1158 = vst.msk [vmem:[#allocation2 + $0x11] sm:$0xff] %vm40_vm0, %v2312_v21  ;;  %v2911_v32 = vld [vmem:[#allocation2 + $0x30] sm:$0xff]  ;;  %1159 = vst.msk [vmem:[#allocation2 + $0x21] sm:$0xff] %vm40_vm0, %v2313_v24  ;;  %v2930_v42 = vld [vmem:[#allocation2 + $0x40] sm:$0xff]  ;;  %v302_v21 = vsel %vm126_vm2, %v2922_v40, 0 }
  0x3b   :  { %v2915_v36 = vld [vmem:[#allocation2 + $0x31] sm:$0xff]  ;;  %2424 = vmatprep.mubr.msk.bf16.mxu0 %vm40_vm0, %v108_v30  ;;  %v2934_v44 = vld [vmem:[#allocation2 + $0x41] sm:$0xff]  ;;  %v3030_v18 = vpack.c.bf16 %v2911_v32, %v2909_v31  ;;  %v386_v27 = vpack.c.bf16 %v2930_v42, %v2911_v32 }
  0x3c   :  { %v2919_v38 = vld [vmem:[#allocation2 + $0x32] sm:$0xff]  ;;  %v2927_v41 = vpack.c.bf16 %v2915_v36, %v2913_v33  ;;  %v2941_v49 = vld [vmem:[#allocation2 + $0x42] sm:$0xff] }
  0x3d   :  { %v2932_v43 = vld [vmem:[#allocation2 + $0x50] sm:$0xff]  ;;  %1160 = vst.msk [vmem:[#allocation2 + $0x31] sm:$0xff] %vm40_vm0, %v2316_v25  ;;  %v2951_v53 = vld [vmem:[#allocation2 + $0x60] sm:$0xff]  ;;  %1161 = vst.msk [vmem:[#allocation2 + $0x41] sm:$0xff] %vm40_vm0, %v2317_v34 }
  0x3e   :  { %v2939_v48 = vld [vmem:[#allocation2 + $0x51] sm:$0xff]  ;;  %2425 = vmatmul.mubr.msk.bf16.vlgmr.msra.gmra.mrb[0].mxu0 %vm40_vm0, %v2927_v41  ;;  %v2955_v55 = vld [vmem:[#allocation2 + $0x61] sm:$0xff]  ;;  %v3038_v20 = vpack.c.bf16 %v2932_v43, %v2930_v42 }
  0x3f   :  { %v2943_v50 = vld [vmem:[#allocation2 + $0x52] sm:$0xff]  ;;  %v2949_v52 = vpack.c.bf16 %v2939_v48, %v2934_v44  ;;  %2433 = vmatpush3.bf16.msra.mxu0 %v208_v39  ;;  %v2963_v59 = vld [vmem:[#allocation2 + $0x62] sm:$0xff] }
  0x40   :  { %v2953_v54 = vld [vmem:[#allocation2 + $0x70] sm:$0xff]  ;;  %1162 = vst.msk [vmem:[#allocation2 + $0x51] sm:$0xff] %vm40_vm0, %v2320_v35  ;;  %2732 = vmatprep.subr.msk.bf16.mxu0 %vm126_vm2, %v2922_v40  ;;  %1163 = vst.msk [vmem:[#allocation2 + $0x61] sm:$0xff] %vm40_vm0, %v2321_v45  ;;  %v2973_v61 = vld [vmem:[#allocation2 + $0x80] sm:$0xff]  ;;  %v283_v40 = vpack.c.bf16 %v2904_v29, %v275_v26  ;;  %v1378_v45 = vsel %vm126_vm2, %v1364_v14, 0 }
  0x41   :  { %v2961_v58 = vld [vmem:[#allocation2 + $0x71] sm:$0xff]  ;;  %2428 = vmatprep.mubr.msk.bf16.mxu0 %vm40_vm0, %v2949_v52  ;;  %v2975_v62 = vld [vmem:[#allocation2 + $0x81] sm:$0xff]  ;;  %v3061_v35 = vpack.c.bf16 %v2953_v54, %v2951_v53  ;;  %v388_v32 = vpack.c.bf16 %v2973_v61, %v2953_v54  ;;  %v489_v54 = vpack.c.bf16 %v2955_v55, %v2939_v48 }
  0x42   :  { %v2965_v60 = vld [vmem:[#allocation2 + $0x72] sm:$0xff]  ;;  %v2977_v63 = vld [vmem:[#allocation2 + $0x82] sm:$0xff]  ;;  %v2992_v5 = vpack.c.bf16 %v2961_v58, %v2955_v55 }
  0x43   :  { %1164 = vst.msk [vmem:[#allocation2 + $0x71] sm:$0xff] %vm40_vm0, %v2324_v46  ;;  %v2981_v1 = vld [vmem:[#allocation2 + $0x11] sm:$0xff]  ;;  %1165 = vst.msk [vmem:[#allocation2 + $0x81] sm:$0xff] %vm40_vm0, %v2325_v51  ;;  %v2994_v6 = vld [vmem:[#allocation2 + $0x21] sm:$0xff]  ;;  %v3116_v57 = vpack.c.bf16 %v2965_v60, %v2963_v59 }
  0x44   :  { %v1187_v4 = vpack.c.bf16 %v2981_v1, %v2898_v22  ;;  %v2996_v7 = vld [vmem:[#allocation2 + $0x31] sm:$0xff]  ;;  %v3006_v11 = vld [vmem:[#allocation2 + $0x41] sm:$0xff]  ;;  %v1465_v51 = vld [vmem:[#allocation5 + $0xc] sm:$0xf] }
  0x45   :  { %v3002_v9 = vpack.c.bf16 %v2996_v7, %v2994_v6  ;;  %v3026_v17 = vld [vmem:[#allocation2 + $0x10] sm:$0xff]  ;;  %v3049_v24 = vld [vmem:[#allocation2 + $0x20] sm:$0xff]  ;;  %v1479_v2 = vsel %vm126_vm2, %v1465_v51, 0  ;;  %v1768_v55 = vld [vmem:[#allocation5 + $0x18] sm:$0xf] }
  0x46   :  { %2514 = vmatprep.mubr.msk.bf16.mxu1 %vm40_vm0, %v1187_v4  ;;  %2429 = vmatmul.mubr.msk.bf16.gmra.mrb[4].mxu0 %vm40_vm0, %v2992_v5  ;;  %v1174_v22 = vpack.c.bf16 %v3026_v17, %v87_v56  ;;  %v3051_v25 = vld [vmem:[#allocation2 + $0x30] sm:$0xff]  ;;  %v3055_v30 = vld [vmem:[#allocation2 + $0x40] sm:$0xff] }
  0x47   :  { %v3008_v13 = vld [vmem:[#allocation2 + $0x51] sm:$0xff]  ;;  %2515 = vmatmul.mubr.msk.bf16.vlgmr.msra.gmra.mrb[0].mxu1 %vm40_vm0, %v3002_v9  ;;  %2434 = vmatprep.mubr.msk.bf16.mxu0 %vm40_vm0, %v95_v8  ;;  %v3019_v16 = vld [vmem:[#allocation2 + $0x61] sm:$0xff]  ;;  %v3065_v39 = vpack.c.bf16 %v3051_v25, %v3049_v24  ;;  %v1462_v42 = vpack.c.bf16 %v3055_v30, %v3051_v25 }
  0x48   :  { %v3016_v15 = vpack.c.bf16 %v3008_v13, %v3006_v11  ;;  %2523 = vmatpush3.bf16.msra.mxu1 %v1285_v10  ;;  %v3057_v34 = vld [vmem:[#allocation2 + $0x50] sm:$0xff]  ;;  %v1172_v56 = vld [vmem:[#allocation2 + $0x60] sm:$0xff]  ;;  %v3087_v10 = vpack.c.bf16 %v2919_v38, %v2917_v37  ;;  %v1564_v48 = vpack.c.bf16 %v3019_v16, %v3008_v13 }
  0x49   :  { %2741 = vmatprep.subr.msk.bf16.mxu1 %vm126_vm2, %v1364_v14  ;;  %v3071_v46 = vpack.c.bf16 %v3057_v34, %v3055_v30  ;;  %v3083_v8 = vld [vmem:[#allocation2 + $0x12] sm:$0xff]  ;;  %v3104_v3 = vld [vmem:[#allocation2 + $0x22] sm:$0xff]  ;;  %v1562_v30 = vpack.c.bf16 %v2994_v6, %v2981_v1  ;;  %v3507_v1 = vpack.c.bf16 %v2975_v62, %v2961_v58  ;;  %v3508_v6 = vpack.c.bf16 %v2917_v37, %v2904_v29 }
  0x4a   :  { %v3021_v12 = vld [vmem:[#allocation2 + $0x71] sm:$0xff]  ;;  %2518 = vmatprep.mubr.msk.bf16.mxu1 %vm40_vm0, %v3016_v15  ;;  %3504 = vst [vmem:[#allocation10_spill] sm:$0xff] %v3087_v10  ;;  %v1663_v58 = vpack.c.bf16 %v3104_v3, %v3083_v8  ;;  %v3510_v29 = vpack.c.bf16 %v2963_v59, %v2943_v50 }
  0x4b   :  { %v3034_v19 = vpack.c.bf16 %v3021_v12, %v3019_v16  ;;  %v3078_v4 = vld [vmem:[#allocation2 + $0x70] sm:$0xff]  ;;  %v799_v16 = vld [vmem:[#allocation5 + $0x1c] sm:$0xf] }
  0x4c   :  { %v3090_v14 = vpack.c.bf16 %v3078_v4, %v1172_v56  ;;  %v3106_v0 = vld [vmem:[#allocation2 + $0x32] sm:$0xff] }
  0x4d   :  { %3503 = vst [vmem:[#allocation9_spill] sm:$0xff] %v3034_v19 }
  0x4e   :  { %2435 = vmatmul.mubr.msk.bf16.vlgmr.msra.gmra.mrb[0].mxu0 %vm40_vm0, %v3030_v18 }
  0x4f   :  { %2519 = vmatmul.mubr.msk.bf16.gmra.mrb[4].mxu1 %vm40_vm0, %v3034_v19  ;;  %2443 = vmatpush3.bf16.msra.mxu0 %v302_v21  ;;  %v3094_v21 = vpack.c.bf16 %v2943_v50, %v2941_v49  ;;  %v3134_v19 = vld [vmem:[#allocation2 + $0x62] sm:$0xff] }
  0x50   :  { %2438 = vmatprep.mubr.msk.bf16.mxu0 %vm40_vm0, %v3038_v20  ;;  %2524 = vmatprep.mubr.msk.bf16.mxu1 %vm40_vm0, %v1174_v22  ;;  %v404_v22 = vsel %vm126_vm2, %v390_v23, 0  ;;  %v1662_v50 = vld [vmem:[#allocation2 + $0x82] sm:$0xff] }
  0x51   :  { %2733 = vmatprep.subr.msk.bf16.mxu0 %vm126_vm2, %v390_v23  ;;  %3505 = vst [vmem:[#allocation11_spill] sm:$0xff] %v3094_v21  ;;  %v3110_v23 = vld [vmem:[#allocation2 + $0x42] sm:$0xff] }
  0x52   :  { %v1664_v37 = vpack.c.bf16 %v3110_v23, %v3106_v0 }
  0x56   :  { %2439 = vmatmul.mubr.msk.bf16.gmra.mrb[4].mxu0 %vm40_vm0, %v3061_v35 }
  0x57   :  { %2525 = vmatmul.mubr.msk.bf16.vlgmr.msra.gmra.mrb[0].mxu1 %vm40_vm0, %v3065_v39  ;;  %2444 = vmatprep.mubr.msk.bf16.mxu0 %vm40_vm0, %v283_v40  ;;  %v1360_v40 = vpack.c.bf16 %v3083_v8, %v275_v26  ;;  %v3112_v26 = vld [vmem:[#allocation2 + $0x52] sm:$0xff]  ;;  %v1970_v8 = vld [vmem:[#allocation5 + $0x20] sm:$0xf] }
  0x58   :  { %2533 = vmatpush3.bf16.msra.mxu1 %v1378_v45  ;;  %2528 = vmatprep.mubr.msk.bf16.mxu1 %vm40_vm0, %v3071_v46  ;;  %v492_v45 = vld [vmem:[#allocation5 + $0x10] sm:$0xf] }
  0x59   :  { %2742 = vmatprep.subr.msk.bf16.mxu1 %vm126_vm2, %v1465_v51  ;;  %v1461_v51 = vpack.c.bf16 %v3049_v24, %v3026_v17  ;;  %v1463_v17 = vpack.c.bf16 %v1172_v56, %v3057_v34  ;;  %v1667_v24 = vld [vmem:[#allocation5 + $0x14] sm:$0xf]  ;;  %v697_v34 = vld [vmem:[#allocation5 + $0x18] sm:$0xf]  ;;  %v3509_v56 = vpack.c.bf16 %v2941_v49, %v2919_v38  ;;  %v1665_v38 = vpack.c.bf16 %v3134_v19, %v3112_v26  ;;  %v1869_v49 = vld [vmem:[#allocation5 + $0x1c] sm:$0xf] }
  0x5a   :  { %v711_v13 = vsel %vm126_vm2, %v697_v34, 0 }
  0x5e   :  { %2445 = vmatmul.mubr.msk.bf16.vlgmr.msra.gmra.mrb[0].mxu0 %vm40_vm0, %v3087_v10  ;;  %v3136_v10 = vld [vmem:[#allocation2 + $0x72] sm:$0xff] }
  0x5f   :  { %2529 = vmatmul.mubr.msk.bf16.gmra.mrb[4].mxu1 %vm40_vm0, %v3090_v14  ;;  %2453 = vmatpush3.bf16.msra.mxu0 %v404_v22  ;;  %v3120_v22 = vpack.c.bf16 %v3106_v0, %v3104_v3  ;;  %v3145_v31 = vpack.c.bf16 %v3136_v10, %v3134_v19  ;;  %v1782_v3 = vsel %vm126_vm2, %v1768_v55, 0  ;;  %v1666_v59 = vpack.c.bf16 %v1662_v50, %v3136_v10  ;;  %v901_v19 = vld [vmem:[#allocation5 + $0x20] sm:$0xf]  ;;  %v3514_v10 = vld [vmem:[#allocation11_spill] sm:$0xff] }
  0x60   :  { %2448 = vmatprep.mubr.msk.bf16.mxu0 %vm40_vm0, %v3094_v21  ;;  %2534 = vmatprep.mubr.msk.bf16.mxu1 %vm40_vm0, %v1360_v40  ;;  %v3127_v40 = vpack.c.bf16 %v3112_v26, %v3110_v23  ;;  %v1566_v21 = vld [vmem:[#allocation5 + $0x10] sm:$0xf]  ;;  %v813_v0 = vsel %vm126_vm2, %v799_v16, 0 }
  0x61   :  { %2734 = vmatprep.subr.msk.bf16.mxu0 %vm126_vm2, %v492_v45  ;;  %3506 = vst [vmem:[#allocation12_spill] sm:$0xff] %v3120_v22 }
  0x66   :  { %2449 = vmatmul.mubr.msk.bf16.gmra.mrb[4].mxu0 %vm40_vm0, %v3116_v57 }
  0x67   :  { %2535 = vmatmul.mubr.msk.bf16.vlgmr.msra.gmra.mrb[0].mxu1 %vm40_vm0, %v3120_v22  ;;  %2454 = vmatprep.mubr.msk.bf16.mxu0 %vm40_vm0, %v385_v47  ;;  %v506_v47 = vsel %vm126_vm2, %v492_v45, 0  ;;  %v594_v22 = vld [vmem:[#allocation5 + $0x14] sm:$0xf]  ;;  %v3169_v45 = vld [vmem:[#allocation2 + $0x80] sm:$0xff] }
  0x68   :  { %2543 = vmatpush3.bf16.msra.mxu1 %v1479_v2  ;;  %2538 = vmatprep.mubr.msk.bf16.mxu1 %vm40_vm0, %v3127_v40  ;;  %v387_v2 = vpack.c.bf16 %v2951_v53, %v2932_v43  ;;  %v487_v43 = vpack.c.bf16 %v2913_v33, %v2902_v28  ;;  %v1580_v53 = vsel %vm126_vm2, %v1566_v21, 0  ;;  %v488_v28 = vpack.c.bf16 %v2934_v44, %v2915_v36 }
  0x69   :  { %2743 = vmatprep.subr.msk.bf16.mxu1 %vm126_vm2, %v1566_v21  ;;  %v1464_v33 = vpack.c.bf16 %v3169_v45, %v3078_v4  ;;  %v608_v25 = vsel %vm126_vm2, %v594_v22, 0  ;;  %v1563_v36 = vpack.c.bf16 %v3006_v11, %v2996_v7  ;;  %v1681_v44 = vsel %vm126_vm2, %v1667_v24, 0  ;;  %v1561_v7 = vld [vmem:[#allocation2 + $0x81] sm:$0xff] }
  0x6a   :  { %v1565_v11 = vpack.c.bf16 %v1561_v7, %v3021_v12  ;;  %v3511_v12 = vpack.c.bf16 %v2977_v63, %v2965_v60  ;;  %v691_v60 = vld [vmem:[#allocation2 + $0x90] sm:$0xff]  ;;  %v1883_v4 = vsel %vm126_vm2, %v1869_v49, 0 }
  0x6e   :  { %2455 = vmatmul.mubr.msk.bf16.vlgmr.msra.gmra.mrb[0].mxu0 %vm40_vm0, %v386_v27 }
  0x6f   :  { %2539 = vmatmul.mubr.msk.bf16.gmra.mrb[4].mxu1 %vm40_vm0, %v3145_v31  ;;  %2463 = vmatpush3.bf16.msra.mxu0 %v506_v47 }
  0x70   :  { %2458 = vmatprep.mubr.msk.bf16.mxu0 %vm40_vm0, %v387_v2  ;;  %2544 = vmatprep.mubr.msk.bf16.mxu1 %vm40_vm0, %v1461_v51 }
  0x71   :  { %2735 = vmatprep.subr.msk.bf16.mxu0 %vm126_vm2, %v594_v22 }
  0x76   :  { %2459 = vmatmul.mubr.msk.bf16.gmra.mrb[4].mxu0 %vm40_vm0, %v388_v32 }
  0x77   :  { %2545 = vmatmul.mubr.msk.bf16.vlgmr.msra.gmra.mrb[0].mxu1 %vm40_vm0, %v1462_v42  ;;  %2464 = vmatprep.mubr.msk.bf16.mxu0 %vm40_vm0, %v487_v43 }
  0x78   :  { %2553 = vmatpush3.bf16.msra.mxu1 %v1580_v53  ;;  %2548 = vmatprep.mubr.msk.bf16.mxu1 %vm40_vm0, %v1463_v17 }
  0x79   :  { %2744 = vmatprep.subr.msk.bf16.mxu1 %vm126_vm2, %v1667_v24 }
  0x7e   :  { %2465 = vmatmul.mubr.msk.bf16.vlgmr.msra.gmra.mrb[0].mxu0 %vm40_vm0, %v488_v28 }
  0x7f   :  { %2549 = vmatmul.mubr.msk.bf16.gmra.mrb[4].mxu1 %vm40_vm0, %v1464_v33  ;;  %2473 = vmatpush3.bf16.msra.mxu0 %v608_v25 }
  0x80   :  { %2468 = vmatprep.mubr.msk.bf16.mxu0 %vm40_vm0, %v489_v54  ;;  %2554 = vmatprep.mubr.msk.bf16.mxu1 %vm40_vm0, %v1562_v30 }
  0x81   :  { %2736 = vmatprep.subr.msk.bf16.mxu0 %vm126_vm2, %v697_v34 }
  0x86   :  { %2469 = vmatmul.mubr.msk.bf16.gmra.mrb[4].mxu0 %vm40_vm0, %v3507_v1 }
  0x87   :  { %2555 = vmatmul.mubr.msk.bf16.vlgmr.msra.gmra.mrb[0].mxu1 %vm40_vm0, %v1563_v36  ;;  %2474 = vmatprep.mubr.msk.bf16.mxu0 %vm40_vm0, %v3508_v6 }
  0x88   :  { %2563 = vmatpush3.bf16.msra.mxu1 %v1681_v44  ;;  %2558 = vmatprep.mubr.msk.bf16.mxu1 %vm40_vm0, %v1564_v48 }
  0x89   :  { %2745 = vmatprep.subr.msk.bf16.mxu1 %vm126_vm2, %v1768_v55 }
  0x8e   :  { %2475 = vmatmul.mubr.msk.bf16.vlgmr.msra.gmra.mrb[0].mxu0 %vm40_vm0, %v3509_v56 }
  0x8f   :  { %2559 = vmatmul.mubr.msk.bf16.gmra.mrb[4].mxu1 %vm40_vm0, %v1565_v11  ;;  %2483 = vmatpush3.bf16.msra.mxu0 %v711_v13 }
  0x90   :  { %2478 = vmatprep.mubr.msk.bf16.mxu0 %vm40_vm0, %v3510_v29  ;;  %2564 = vmatprep.mubr.msk.bf16.mxu1 %vm40_vm0, %v1663_v58 }
  0x91   :  { %2737 = vmatprep.subr.msk.bf16.mxu0 %vm126_vm2, %v799_v16 }
  0x96   :  { %2479 = vmatmul.mubr.msk.bf16.gmra.mrb[4].mxu0 %vm40_vm0, %v3511_v12 }
  0x97   :  { %2565 = vmatmul.mubr.msk.bf16.vlgmr.msra.gmra.mrb[0].mxu1 %vm40_vm0, %v1664_v37  ;;  %2484 = vmatprep.mubr.msk.bf16.mxu0 %vm40_vm0, %v3030_v18  ;;  %v695_v18 = vpack.c.bf16 %v691_v60, %v2973_v61  ;;  %v915_v61 = vsel %vm126_vm2, %v901_v19, 0 }
  0x98   :  { %2573 = vmatpush3.bf16.msra.mxu1 %v1782_v3  ;;  %2568 = vmatprep.mubr.msk.bf16.mxu1 %vm40_vm0, %v1665_v38 }
  0x99   :  { %2746 = vmatprep.subr.msk.bf16.mxu1 %vm126_vm2, %v1869_v49 }
  0x9e   :  { %2485 = vmatmul.mubr.msk.bf16.vlgmr.msra.gmra.mrb[0].mxu0 %vm40_vm0, %v3038_v20  ;;  %v1767_v20 = vpack.c.bf16 %v691_v60, %v3169_v45 }
  0x9f   :  { %2569 = vmatmul.mubr.msk.bf16.gmra.mrb[4].mxu1 %vm40_vm0, %v1666_v59  ;;  %2493 = vmatpush3.bf16.msra.mxu0 %v813_v0 }
  0xa0   :  { %2488 = vmatprep.mubr.msk.bf16.mxu0 %vm40_vm0, %v3061_v35  ;;  %2574 = vmatprep.mubr.msk.bf16.mxu1 %vm40_vm0, %v3065_v39  ;;  %v793_v35 = vld [vmem:[#allocation2 + $0x91] sm:$0xff]  ;;  %v1984_v39 = vsel %vm126_vm2, %v1970_v8, 0 }
  0xa1   :  { %2738 = vmatprep.subr.msk.bf16.mxu0 %vm126_vm2, %v901_v19 }
  0xa6   :  { %2489 = vmatmul.mubr.msk.bf16.gmra.mrb[4].mxu0 %vm40_vm0, %v695_v18 }
  0xa7   :  { %2575 = vmatmul.mubr.msk.bf16.vlgmr.msra.gmra.mrb[0].mxu1 %vm40_vm0, %v3071_v46  ;;  %2494 = vmatprep.mubr.msk.bf16.mxu0 %vm40_vm0, %v2927_v41  ;;  %v797_v41 = vpack.c.bf16 %v793_v35, %v2975_v62  ;;  %v3513_v46 = vld [vmem:[#allocation9_spill] sm:$0xff]  ;;  %v3515_v62 = vld [vmem:[#allocation12_spill] sm:$0xff] }
  0xa8   :  { %2583 = vmatpush3.bf16.msra.mxu1 %v1883_v4  ;;  %2578 = vmatprep.mubr.msk.bf16.mxu1 %vm40_vm0, %v3090_v14 }
  0xa9   :  { %2747 = vmatprep.subr.msk.bf16.mxu1 %vm126_vm2, %v1970_v8 }
  0xae   :  { %2495 = vmatmul.mubr.msk.bf16.vlgmr.msra.gmra.mrb[0].mxu0 %vm40_vm0, %v2949_v52  ;;  %v3512_v52 = vld [vmem:[#allocation10_spill] sm:$0xff] }
  0xaf   :  { %2579 = vmatmul.mubr.msk.bf16.gmra.mrb[4].mxu1 %vm40_vm0, %v1767_v20  ;;  %2503 = vmatpush3.bf16.msra.mxu0 %v915_v61 }
  0xb0   :  { %2498 = vmatprep.mubr.msk.bf16.mxu0 %vm40_vm0, %v2992_v5  ;;  %2584 = vmatprep.mubr.msk.bf16.mxu1 %vm40_vm0, %v3002_v9  ;;  %v1868_v5 = vpack.c.bf16 %v793_v35, %v1561_v7  ;;  %v895_v9 = vld [vmem:[#allocation2 + $0x92] sm:$0xff] }
  0xb1   :  { %v1969_v14 = vpack.c.bf16 %v895_v9, %v1662_v50 }
  0xb6   :  { %2499 = vmatmul.mubr.msk.bf16.gmra.mrb[4].mxu0 %vm40_vm0, %v797_v41 }
  0xb7   :  { %2585 = vmatmul.mubr.msk.bf16.vlgmr.msra.gmra.mrb[0].mxu1 %vm40_vm0, %v3016_v15  ;;  %2504 = vmatprep.mubr.msk.bf16.mxu0 %vm40_vm0, %v3512_v52  ;;  %v899_v15 = vpack.c.bf16 %v895_v9, %v2977_v63 }
  0xb8   :  { %2593 = vmatpush3.bf16.msra.mxu1 %v1984_v39  ;;  %2588 = vmatprep.mubr.msk.bf16.mxu1 %vm40_vm0, %v3513_v46 }
  0xbe   :  { %2505 = vmatmul.mubr.msk.bf16.vlgmr.msra.gmra.mrb[0].mxu0 %vm40_vm0, %v3514_v10 }
  0xbf   :  { %2589 = vmatmul.mubr.msk.bf16.gmra.mrb[4].mxu1 %vm40_vm0, %v1868_v5  ;;  %2508 = vmatprep.mubr.msk.bf16.mxu0 %vm40_vm0, %v3116_v57 }
  0xc0   :  { %2594 = vmatprep.mubr.msk.bf16.mxu1 %vm40_vm0, %v3515_v62 }
  0xc6   :  { %2509 = vmatmul.mubr.msk.bf16.gmra.mrb[4].mxu0 %vm40_vm0, %v899_v15 }
  0xc7   :  { %2595 = vmatmul.mubr.msk.bf16.vlgmr.msra.gmra.mrb[0].mxu1 %vm40_vm0, %v3127_v40 }
  0xc8   :  { %2598 = vmatprep.mubr.msk.bf16.mxu1 %vm40_vm0, %v3145_v31 }
  0xcf   :  { %2599 = vmatmul.mubr.msk.bf16.gmra.mrb[4].mxu1 %vm40_vm0, %v1969_v14 }
 0x191   :  { %v3284_v21 = vpop.f32.mrb[0].mxu0 }
 0x192   :  { %v3286_v57 = vpop.f32.mrb[1].mxu0  ;;  %v1014_v22 = vmul.f32 %v3284_v21, %v3284_v21  ;;  %v994_v47 = vsel %vm990_vm3, %v3284_v21, 0.0 }
 0x193   :  { %v1012_v23 = vmul.f32 %v3286_v57, %v3286_v57  ;;  %v3290_v63 = vpop.f32.mrb[2].mxu0  ;;  %v991_v40 = vsel %vm990_vm3, %v3286_v57, 0.0 }
 0x194   :  { %v3292_v26 = vpop.f32.mrb[3].mxu0  ;;  %v1015_v32 = vmul.f32 %v3290_v63, %v3290_v63  ;;  %v1023_v17 = vsel %vm990_vm3, %v1014_v22, 0.0  ;;  %v996_v28 = vsel %vm990_vm3, %v3290_v63, 0.0 }
 0x195   :  { %v992_v27 = vsel %vm990_vm3, %v3292_v26, 0.0  ;;  %v1013_v31 = vmul.f32 %v3292_v26, %v3292_v26  ;;  %v1020_v51 = vsel %vm990_vm3, %v1012_v23, 0.0 }
 0x196   :  { %v993_v2 = vadd.f32 %v992_v27, %v991_v40  ;;  %v1025_v34 = vsel %vm990_vm3, %v1015_v32, 0.0 }
 0x197   :  { %v1021_v42 = vsel %vm990_vm3, %v1013_v31, 0.0 }
 0x198   :  { %v995_v43 = vadd.f32 %v994_v47, %v993_v2  ;;  %v1022_v53 = vadd.f32 %v1021_v42, %v1020_v51 }
 0x199   :  { %v3309_v24 = vpop.f32.mrb[4].mxu0 }
 0x19a   :  { %v3311_v45 = vpop.f32.mrb[0].mxu1  ;;  %v1024_v33 = vadd.f32 %v1023_v17, %v1022_v53  ;;  %v1018_v54 = vmul.f32 %v3309_v24, %v3309_v24  ;;  %v3317_v25 = vpop.f32.mrb[5].mxu0  ;;  %v997_v36 = vadd.f32 %v996_v28, %v995_v43  ;;  %v1002_v29 = vsel %vm990_vm3, %v3309_v24, 0.0 }
 0x19b   :  { %v3319_v30 = vpop.f32.mrb[1].mxu1  ;;  %v998_v44 = vsel %vm990_vm3, %v3317_v25, 0.0  ;;  %v1016_v48 = vmul.f32 %v3317_v25, %v3317_v25  ;;  %v3326_v55 = vpop.f32.mrb[6].mxu0  ;;  %v2082_v6 = vmul.f32 %v3311_v45, %v3311_v45  ;;  %v2062_v3 = vsel %vm990_vm3, %v3311_v45, 0.0 }
 0x19c   :  { %v3328_v1 = vpop.f32.mrb[2].mxu1  ;;  %v1026_v7 = vadd.f32 %v1025_v34, %v1024_v33  ;;  %v3332_v11 = vpop.f32.mrb[7].mxu0  ;;  %v999_v58 = vadd.f32 %v998_v44, %v997_v36  ;;  %v2080_v56 = vmul.f32 %v3319_v30, %v3319_v30  ;;  %v1031_v37 = vsel %vm990_vm3, %v1018_v54, 0.0 }
 0x19d   :  { %v3334_v13 = vpop.f32.mrb[3].mxu1  ;;  %v1027_v16 = vsel %vm990_vm3, %v1016_v48, 0.0  ;;  %v2059_v49 = vsel %vm990_vm3, %v3319_v30, 0.0  ;;  %v1000_v12 = vsel %vm990_vm3, %v3332_v11, 0.0  ;;  %v1017_v50 = vmul.f32 %v3332_v11, %v3332_v11 }
 0x19e   :  { %v1028_v38 = vadd.f32 %v1027_v16, %v1026_v7  ;;  %v2060_v59 = vsel %vm990_vm3, %v3334_v13, 0.0  ;;  %v2091_v0 = vsel %vm990_vm3, %v2082_v6, 0.0  ;;  %v1001_v19 = vadd.f32 %v1000_v12, %v999_v58 }
 0x19f   :  { %v2061_v60 = vadd.f32 %v2060_v59, %v2059_v49  ;;  %v2081_v18 = vmul.f32 %v3334_v13, %v3334_v13  ;;  %v2088_v4 = vsel %vm990_vm3, %v2080_v56, 0.0  ;;  %v1019_v8 = vmul.f32 %v3326_v55, %v3326_v55 }
 0x1a0   :  { %v2083_v20 = vmul.f32 %v3328_v1, %v3328_v1  ;;  %v1029_v61 = vsel %vm990_vm3, %v1017_v50, 0.0  ;;  %v1003_v41 = vadd.f32 %v1002_v29, %v1001_v19  ;;  %v1004_v10 = vsel %vm990_vm3, %v3326_v55, 0.0 }
 0x1a1   :  { %v1030_v39 = vadd.f32 %v1029_v61, %v1028_v38  ;;  %v2063_v52 = vadd.f32 %v2062_v3, %v2061_v60  ;;  %v2089_v46 = vsel %vm990_vm3, %v2081_v18, 0.0  ;;  %v2064_v62 = vsel %vm990_vm3, %v3328_v1, 0.0 }
 0x1a2   :  { %v3361_v35 = vpop.f32.mrb[4].mxu1  ;;  %v2090_v9 = vadd.f32 %v2089_v46, %v2088_v4  ;;  %v1005_v23 = vadd.f32 %v1004_v10, %v1003_v41  ;;  %v1033_v2 = vsel %vm990_vm3, %v1019_v8, 0.0  ;;  %v2093_v47 = vsel %vm990_vm3, %v2083_v20, 0.0 }
 0x1a3   :  { %v3364_v5 = vpop.f32.mrb[5].mxu1  ;;  %v1032_v22 = vadd.f32 %v1031_v37, %v1030_v39  ;;  %v2065_v40 = vadd.f32 %v2064_v62, %v2063_v52  ;;  %v2086_v36 = vmul.f32 %v3361_v35, %v3361_v35  ;;  %v2070_v48 = vsel %vm990_vm3, %v3361_v35, 0.0 }
 0x1a4   :  { %v2066_v15 = vsel %vm990_vm3, %v3364_v5, 0.0  ;;  %v3372_v14 = vpop.f32.mrb[6].mxu1  ;;  %v2084_v27 = vmul.f32 %v3364_v5, %v3364_v5  ;;  %v2092_v51 = vadd.f32 %v2091_v0, %v2090_v9  ;;  %v1006_v32 = vrot.slane %v1005_v23, 4 }
 0x1a5   :  { %v3376_v31 = vpop.f32.mrb[7].mxu1  ;;  %v1034_v42 = vadd.f32 %v1033_v2, %v1032_v22  ;;  %v2067_v43 = vadd.f32 %v2066_v15, %v2065_v40  ;;  %v2087_v56 = vmul.f32 %v3372_v14, %v3372_v14  ;;  %v2072_v37 = vsel %vm990_vm3, %v3372_v14, 0.0 }
 0x1a6   :  { %v2095_v53 = vsel %vm990_vm3, %v2084_v27, 0.0  ;;  %v2094_v17 = vadd.f32 %v2093_v47, %v2092_v51  ;;  %v2068_v28 = vsel %vm990_vm3, %v3376_v31, 0.0  ;;  %v2085_v33 = vmul.f32 %v3376_v31, %v3376_v31 }
 0x1a7   :  { %v1007_v54 = vadd.f32 %v1006_v32, %v1005_v23  ;;  %v1035_v34 = vrot.slane %v1034_v42, 4  ;;  %v2069_v44 = vadd.f32 %v2068_v28, %v2067_v43  ;;  %v2099_v38 = vsel %vm990_vm3, %v2086_v36, 0.0 }
 0x1a8   :  { %v2096_v6 = vadd.f32 %v2095_v53, %v2094_v17  ;;  %v2097_v7 = vsel %vm990_vm3, %v2085_v33, 0.0  ;;  %v2101_v0 = vsel %vm990_vm3, %v2087_v56, 0.0 }
 0x1a9   :  { %v1008_v58 = vrot.slane %v1007_v54, 2  ;;  %v1036_v16 = vadd.f32 %v1035_v34, %v1034_v42  ;;  %v2071_v29 = vadd.f32 %v2070_v48, %v2069_v44 }
 0x1aa   :  { %v2098_v3 = vadd.f32 %v2097_v7, %v2096_v6 }
 0x1ab   :  { %v2073_v49 = vadd.f32 %v2072_v37, %v2071_v29  ;;  %v1009_v12 = vadd.f32 %v1008_v58, %v1007_v54  ;;  %v1037_v50 = vrot.slane %v1036_v16, 2 }
 0x1ac   :  { %v2100_v59 = vadd.f32 %v2099_v38, %v2098_v3 }
 0x1ad   :  { %v2074_v19 = vrot.slane %v2073_v49, 4  ;;  %v1010_v60 = vrot.slane %v1009_v12, 1  ;;  %v1038_v18 = vadd.f32 %v1037_v50, %v1036_v16 }
 0x1ae   :  { %v2102_v4 = vadd.f32 %v2101_v0, %v2100_v59 }
 0x1af   :  { %v2075_v8 = vadd.f32 %v2074_v19, %v2073_v49  ;;  %v1011_v20 = vadd.f32 %v1010_v60, %v1009_v12  ;;  %v1039_v61 = vrot.slane %v1038_v18, 1 }
 0x1b0   :  { %v2103_v41 = vrot.slane %v2102_v4, 4 }
 0x1b1   :  { %v2076_v39 = vrot.slane %v2075_v8, 2  ;;  %1046 = vrot.lane.b32.xlu1 %v1011_v20, %s2815_s1  ;;  %1042 = vrot.lane.b32.xlu0 %v1011_v20, %s2816_s6  ;;  %v1040_v46 = vadd.f32 %v1039_v61, %v1038_v18 }
 0x1b2   :  { %v2104_v52 = vadd.f32 %v2103_v41, %v2102_v4 }
 0x1b3   :  { %v2077_v10 = vadd.f32 %v2076_v39, %v2075_v8  ;;  %v1101_v39 = vlaneseq }
 0x1b4   :  { %v2105_v62 = vrot.slane %v2104_v52, 2 }
 0x1b5   :  { %1055 = vrot.lane.b32.xlu1 %v1040_v46, %s2816_s6  ;;  %1050 = vrot.lane.b32.xlu0 %v1011_v20, %s2817_s7  ;;  %v2078_v9 = vrot.slane %v2077_v10, 1 }
 0x1b6   :  { %v2106_v15 = vadd.f32 %v2105_v62, %v2104_v52 }
 0x1b7   :  { %v2079_v23 = vadd.f32 %v2078_v9, %v2077_v10  ;;  %v1102_v10 = vshrl.u32 %v1101_v39, 7 }
 0x1b8   :  { %v2107_v22 = vrot.slane %v2106_v15, 1 }
 0x1b9   :  { %1059 = vrot.lane.b32.xlu1 %v1040_v46, %s2815_s1  ;;  %2110 = vrot.lane.b32.xlu0 %v2079_v23, %s2816_s6 }
 0x1ba   :  { %v2108_v40 = vadd.f32 %v2107_v22, %v2106_v15  ;;  %v1103_v22 = vsub.s32 0, %v1102_v10 }
 0x1bd   :  { %2123 = vrot.lane.b32.xlu1 %v2108_v40, %s2816_s6  ;;  %2114 = vrot.lane.b32.xlu0 %v2079_v23, %s2815_s1 }
 0x1c1   :  { %2127 = vrot.lane.b32.xlu1 %v2108_v40, %s2815_s1  ;;  %2118 = vrot.lane.b32.xlu0 %v2079_v23, %s2817_s7 }
 0x1c5   :  { %2131 = vrot.lane.b32.xlu1 %v2108_v40, %s2817_s7  ;;  %1063 = vrot.lane.b32.xlu0 %v1040_v46, %s2817_s7 }
 0x223   :  { %v1047_v27 = vpop.permute.xlu1 %1046  ;;  %v1043_v2 = vpop.permute.xlu0 %1042 }
 0x224   :  { %v1045_v47 = vadd.f32 %v1043_v2, %v1011_v20 }
 0x226   :  { %v1049_v51 = vadd.f32 %v1047_v27, %v1045_v47 }
 0x227   :  { %v1056_v32 = vpop.permute.xlu1 %1055  ;;  %v1051_v42 = vpop.permute.xlu0 %1050 }
 0x228   :  { %v1053_v43 = vadd.f32 %v1051_v42, %v1049_v51  ;;  %v1058_v6 = vadd.f32 %v1056_v32, %v1040_v46 }
 0x22a   :  { %v1067_v53 = vmul.f32 0.00390625, %v1053_v43 }
 0x22b   :  { %v1060_v17 = vpop.permute.xlu1 %1059  ;;  %v2111_v28 = vpop.permute.xlu0 %2110 }
 0x22c   :  { %1074 = vrot.lane.b32.xlu0 %v1067_v53, %s2812_s20  ;;  %v2113_v34 = vadd.f32 %v2111_v28, %v2079_v23  ;;  %v1062_v16 = vadd.f32 %v1060_v17, %v1058_v6  ;;  %v1069_v50 = vmul.f32 %v1067_v53, %v1067_v53 }
 0x22f   :  { %v2124_v33 = vpop.permute.xlu1 %2123  ;;  %v2115_v54 = vpop.permute.xlu0 %2114 }
 0x230   :  { %1077 = vrot.lane.b32.xlu0 %v1067_v53, %s2818_s8  ;;  %v2117_v36 = vadd.f32 %v2115_v54, %v2113_v34  ;;  %v2126_v7 = vadd.f32 %v2124_v33, %v2108_v40 }
 0x233   :  { %v2128_v44 = vpop.permute.xlu1 %2127  ;;  %v2119_v48 = vpop.permute.xlu0 %2118 }
 0x234   :  { %v2121_v58 = vadd.f32 %v2119_v48, %v2117_v36  ;;  %1080 = vrot.lane.b32.xlu0 %v1067_v53, %s2819_s9  ;;  %v2130_v56 = vadd.f32 %v2128_v44, %v2126_v7 }
 0x236   :  { %v2135_v29 = vmul.f32 0.00390625, %v2121_v58 }
 0x237   :  { %v2132_v37 = vpop.permute.xlu1 %2131  ;;  %v1064_v3 = vpop.permute.xlu0 %1063 }
 0x238   :  { %v2134_v38 = vadd.f32 %v2132_v37, %v2130_v56  ;;  %v1066_v49 = vadd.f32 %v1064_v3, %v1062_v16  ;;  %2148 = vrot.lane.b32.xlu0 %v2135_v29, %s2819_s9  ;;  %2142 = vrot.lane.b32.xlu1 %v2135_v29, %s2812_s20  ;;  %v2137_v0 = vmul.f32 %v2135_v29, %v2135_v29 }
 0x23a   :  { %v2136_v12 = vmul.f32 0.00390625, %v2134_v38  ;;  %v1068_v59 = vmul.f32 0.00390625, %v1066_v49 }
 0x23c   :  { %v1070_v19 = vsub.f32 %v1068_v59, %v1069_v50  ;;  %2145 = vrot.lane.b32.xlu1 %v2135_v29, %s2818_s8  ;;  %v2138_v60 = vsub.f32 %v2136_v12, %v2137_v0 }
 0x23e   :  { %v1071_v18 = vadd.f32 1e-05, %v1070_v19  ;;  %v2139_v4 = vadd.f32 1e-05, %v2138_v60 }
 0x240   :  { %2758 = vrsqrt.f32 %v1071_v18 }
 0x241   :  { %2760 = vrsqrt.f32 %v2139_v4 }
 0x24a   :  { %v2759_v8 = vpop.eup %2758 }
 0x24b   :  { %1092 = vrot.lane.b32.xlu0 %v2759_v8, %s2818_s8  ;;  %1089 = vrot.lane.b32.xlu1 %v2759_v8, %s2812_s20  ;;  %v2761_v20 = vpop.eup %2760 }
 0x24f   :  { %1095 = vrot.lane.b32.xlu0 %v2759_v8, %s2819_s9  ;;  %2155 = vrot.lane.b32.xlu1 %v2761_v20, %s2812_s20 }
 0x253   :  { %2158 = vrot.lane.b32.xlu1 %v2761_v20, %s2818_s8 }
 0x257   :  { %2161 = vrot.lane.b32.xlu1 %v2761_v20, %s2819_s9 }
 0x29e   :  { %v1075_v61 = vpop.permute.xlu0 %1074 }
 0x29f   :  { %v1084_v62 = vsel %vm1083_vm4, %v1067_v53, %v1075_v61 }
 0x2a2   :  { %v1078_v41 = vpop.permute.xlu0 %1077 }
 0x2a3   :  { %v1085_v23 = vsel %vm40_vm0, %v1084_v62, %v1078_v41 }
 0x2a6   :  { %v1081_v52 = vpop.permute.xlu0 %1080 }
 0x2a7   :  { %v1087_v40 = vsel %vm1086_vm5, %v1085_v23, %v1081_v52 }
 0x2a8   :  { %v1104_v51 = vrot.slane %v1087_v40, %v1103_v22 }
 0x2aa   :  { %v2143_v46 = vpop.permute.xlu1 %2142  ;;  %v2149_v9 = vpop.permute.xlu0 %2148  ;;  %v1105_v33 = vsub.f32 %v3286_v57, %v1104_v51  ;;  %v1106_v54 = vsub.f32 %v3292_v26, %v1104_v51  ;;  %v1107_v34 = vsub.f32 %v3284_v21, %v1104_v51  ;;  %v1108_v44 = vsub.f32 %v3290_v63, %v1104_v51 }
 0x2ab   :  { %v2151_v27 = vsel %vm1083_vm4, %v2135_v29, %v2143_v46  ;;  %v1109_v48 = vsub.f32 %v3317_v25, %v1104_v51  ;;  %v1110_v6 = vsub.f32 %v3332_v11, %v1104_v51  ;;  %v1111_v58 = vsub.f32 %v3309_v24, %v1104_v51 }
 0x2ac   :  { %v1112_v16 = vsub.f32 %v3326_v55, %v1104_v51 }
 0x2ae   :  { %v2146_v15 = vpop.permute.xlu1 %2145 }
 0x2af   :  { %v2152_v32 = vsel %vm40_vm0, %v2151_v27, %v2146_v15 }
 0x2b0   :  { %v2153_v43 = vsel %vm1086_vm5, %v2152_v32, %v2149_v9 }
 0x2b1   :  { %v2170_v56 = vrot.slane %v2153_v43, %v1103_v22 }
 0x2b3   :  { %v2173_v61 = vsub.f32 %v3311_v45, %v2170_v56  ;;  %v2174_v41 = vsub.f32 %v3328_v1, %v2170_v56  ;;  %v2175_v52 = vsub.f32 %v3364_v5, %v2170_v56  ;;  %v2176_v46 = vsub.f32 %v3376_v31, %v2170_v56 }
 0x2b4   :  { %v2177_v10 = vsub.f32 %v3361_v35, %v2170_v56  ;;  %v2178_v62 = vsub.f32 %v3372_v14, %v2170_v56 }
 0x2bd   :  { %v1090_v2 = vpop.permute.xlu1 %1089  ;;  %v1093_v47 = vpop.permute.xlu0 %1092 }
 0x2be   :  { %v1098_v42 = vsel %vm1083_vm4, %v2759_v8, %v1090_v2  ;;  %v2171_v8 = vsub.f32 %v3319_v30, %v2170_v56 }
 0x2bf   :  { %v1099_v53 = vsel %vm40_vm0, %v1098_v42, %v1093_v47 }
 0x2c1   :  { %v2156_v17 = vpop.permute.xlu1 %2155  ;;  %v1096_v28 = vpop.permute.xlu0 %1095 }
 0x2c2   :  { %v1100_v36 = vsel %vm1086_vm5, %v1099_v53, %v1096_v28  ;;  %v2164_v57 = vsel %vm1083_vm4, %v2761_v20, %v2156_v17  ;;  %v2172_v20 = vsub.f32 %v3334_v13, %v2170_v56 }
 0x2c3   :  { %v1116_v7 = vrot.slane %v1100_v36, %v1103_v22 }
 0x2c5   :  { %v1117_v29 = vmul.f32 %v1116_v7, %v1105_v33  ;;  %v1118_v26 = vmul.f32 %v1116_v7, %v1106_v54  ;;  %v1119_v37 = vmul.f32 %v1116_v7, %v1107_v34  ;;  %v1120_v21 = vmul.f32 %v1116_v7, %v1108_v44  ;;  %v2159_v3 = vpop.permute.xlu1 %2158 }
 0x2c6   :  { %v1121_v38 = vmul.f32 %v1116_v7, %v1109_v48  ;;  %v1122_v49 = vmul.f32 %v1116_v7, %v1110_v6  ;;  %v1123_v63 = vmul.f32 %v1116_v7, %v1111_v58  ;;  %v1124_v12 = vmul.f32 %v1116_v7, %v1112_v16 }
 0x2c7   :  { %v1125_v25 = vmax.f32 %v1117_v29, 0.0  ;;  %v1126_v50 = vmax.f32 %v1118_v26, 0.0  ;;  %v1127_v11 = vmax.f32 %v1119_v37, 0.0  ;;  %v1128_v59 = vmax.f32 %v1120_v21, 0.0 }
 0x2c8   :  { %v1129_v0 = vmax.f32 %v1121_v38, 0.0  ;;  %v1130_v24 = vmax.f32 %v1122_v49, 0.0  ;;  %v1131_v19 = vmax.f32 %v1123_v63, 0.0  ;;  %v1132_v55 = vmax.f32 %v1124_v12, 0.0 }
 0x2c9   :  { %1133 = vst.msk [vmem:[%s3498_s2] sm:$0xff] %vm990_vm3, %v1125_v25  ;;  %1134 = vst.msk [vmem:[%s3498_s2 + $0x8] sm:$0xff] %vm990_vm3, %v1126_v50  ;;  %v2165_v60 = vsel %vm40_vm0, %v2164_v57, %v2159_v3  ;;  %v2162_v18 = vpop.permute.xlu1 %2161 }
 0x2ca   :  { %1135 = vst.msk [vmem:[%s3498_s2 + $0x10] sm:$0xff] %vm990_vm3, %v1127_v11  ;;  %1136 = vst.msk [vmem:[%s3498_s2 + $0x18] sm:$0xff] %vm990_vm3, %v1128_v59  ;;  %v2166_v4 = vsel %vm1086_vm5, %v2165_v60, %v2162_v18 }
 0x2cb   :  { %1137 = vst.msk [vmem:[%s3498_s2 + $0x20] sm:$0xff] %vm990_vm3, %v1129_v0  ;;  %1138 = vst.msk [vmem:[%s3498_s2 + $0x28] sm:$0xff] %vm990_vm3, %v1130_v24  ;;  %v2182_v39 = vrot.slane %v2166_v4, %v1103_v22 }
 0x2cc   :  { %1139 = vst.msk [vmem:[%s3498_s2 + $0x30] sm:$0xff] %vm990_vm3, %v1131_v19  ;;  %1140 = vst.msk [vmem:[%s3498_s2 + $0x38] sm:$0xff] %vm990_vm3, %v1132_v55 }
 0x2cd   :  { %v2183_v9 = vmul.f32 %v2182_v39, %v2171_v8  ;;  %v2184_v15 = vmul.f32 %v2182_v39, %v2172_v20  ;;  %v2185_v23 = vmul.f32 %v2182_v39, %v2173_v61  ;;  %v2186_v40 = vmul.f32 %v2182_v39, %v2174_v41 }
 0x2ce   :  { %v2187_v30 = vmul.f32 %v2182_v39, %v2175_v52  ;;  %v2188_v27 = vmul.f32 %v2182_v39, %v2176_v46  ;;  %v2189_v13 = vmul.f32 %v2182_v39, %v2177_v10  ;;  %v2190_v2 = vmul.f32 %v2182_v39, %v2178_v62 }
 0x2cf   :  { %v2191_v45 = vmax.f32 %v2183_v9, 0.0  ;;  %v2192_v47 = vmax.f32 %v2184_v15, 0.0  ;;  %v2193_v1 = vmax.f32 %v2185_v23, 0.0  ;;  %v2194_v22 = vmax.f32 %v2186_v40, 0.0 }
 0x2d0   :  { %v2195_v51 = vmax.f32 %v2187_v30, 0.0  ;;  %v2196_v5 = vmax.f32 %v2188_v27, 0.0  ;;  %v2197_v32 = vmax.f32 %v2189_v13, 0.0  ;;  %v2198_v31 = vmax.f32 %v2190_v2, 0.0 }
 0x2d1   :  { %2286 = vst.msk [vmem:[%s3498_s2 + $0x40] sm:$0xff] %vm990_vm3, %v2191_v45  ;;  %2287 = vst.msk [vmem:[%s3498_s2 + $0x48] sm:$0xff] %vm990_vm3, %v2192_v47 }
 0x2d2   :  { %2288 = vst.msk [vmem:[%s3498_s2 + $0x50] sm:$0xff] %vm990_vm3, %v2193_v1  ;;  %2289 = vst.msk [vmem:[%s3498_s2 + $0x58] sm:$0xff] %vm990_vm3, %v2194_v22 }
 0x2d3   :  { %2290 = vst.msk [vmem:[%s3498_s2 + $0x60] sm:$0xff] %vm990_vm3, %v2195_v51  ;;  %2291 = vst.msk [vmem:[%s3498_s2 + $0x68] sm:$0xff] %vm990_vm3, %v2196_v5 }
 0x2d4   :  { %2292 = vst.msk [vmem:[%s3498_s2 + $0x70] sm:$0xff] %vm990_vm3, %v2197_v32  ;;  %2293 = vst.msk [vmem:[%s3498_s2 + $0x78] sm:$0xff] %vm990_vm3, %v2198_v31 }
 0x2d5   :  { %2212 = vsyncpa [#allocation4], 1 }
 0x2d6   :  { %2213 = vsyncpa [#allocation6], 1 }

</bundles_post_ra>
